<compile_context>
chip_gen: v5e
topology: v5e:2x2
jax: 0.10.0
libtpu: 0.0.40
codegen_flags: <defaults>
</compile_context>

<pallas_src>
import jax
import jax.numpy as jnp
from jax.experimental import pallas as pl
from jax.experimental.pallas import tpu as pltpu


def _text_criterion_kernel(logits_ref, labels_ref, seq_ref, loss_ref,
                           m_ref, l_ref, lbl_ref, idx_ref):
    """One (token_tile, vocab_tile) block of fused cross-entropy + argmax.

    logits_ref: (TN, TV) float   -- tile of token logits (vocab on lanes)
    labels_ref: (TN, 1)  int32   -- target ids (-1 marks padded rows)
    seq_ref:    (1, TN)  int32   -- lane-dense argmax per token (written at last vocab step)
    loss_ref:   (1, 1, 1) f32    -- per-token-tile partial NLL sum
    m/l/lbl/idx_ref: (TN, 1)     -- online LSE / label-logit / argmax state
    """
    k = pl.program_id(1)
    num_k = pl.num_programs(1)
    tn, tv = logits_ref.shape

    @pl.when(k == 0)
    def _init():
        m_ref[...] = jnp.full_like(m_ref, -jnp.inf)   # running row max
        l_ref[...] = jnp.zeros_like(l_ref)            # running sum exp(x - m)
        lbl_ref[...] = jnp.zeros_like(lbl_ref)        # gathered label logit
        idx_ref[...] = jnp.zeros_like(idx_ref)        # running argmax index

    x = logits_ref[...].astype(jnp.float32)           # (TN, TV)
    labels = labels_ref[...]                          # (TN, 1) int32

    # Global vocab id of each lane in this tile (reused for the label gather).
    col = jax.lax.broadcasted_iota(jnp.int32, x.shape, 1) + k * tv

    tile_max = jnp.max(x, axis=-1, keepdims=True)                       # (TN,1)
    tile_arg = jnp.argmax(x, axis=-1).astype(jnp.int32).reshape(tn, 1)  # (TN,1)

    m_old = m_ref[...]
    m_new = jnp.maximum(m_old, tile_max)

    # Online softmax denominator (rescale the previous partial sum).
    l_ref[...] = (l_ref[...] * jnp.exp(m_old - m_new)
                  + jnp.sum(jnp.exp(x - m_new), axis=-1, keepdims=True))
    # The label id falls in exactly one vocab tile -> accumulate its logit.
    lbl_ref[...] = lbl_ref[...] + jnp.sum(
        jnp.where(col == labels, x, 0.0), axis=-1, keepdims=True)
    # Running argmax; strict '>' keeps the first occurrence across vocab tiles.
    idx_ref[...] = jnp.where(tile_max > m_old, tile_arg + k * tv, idx_ref[...])
    m_ref[...] = m_new

    @pl.when(k == num_k - 1)
    def _finalize():
        lse = m_ref[...] + jnp.log(l_ref[...])        # (TN, 1)
        nll = lse - lbl_ref[...]                      # per-token NLL
        valid = (labels >= 0).astype(jnp.float32)     # mask padded tail rows
        part = jnp.sum(nll * valid, axis=0, keepdims=True)   # (1, 1)
        loss_ref[...] = part.reshape(1, 1, 1)
        # Lane-dense greedy-decode writeback: per-row column -> one token row.
        seq_ref[0, :] = idx_ref[...][:, 0]


def text_criterion_forward(logits, label_ids, *, token_tile=128,
                           max_vocab_tile=4096,
                           vmem_limit_bytes=48 * 1024 * 1024):
    """Pallas implementation of TextCriterion.forward tensor path.

    Args:
      logits:    (B, S, V) float array (f32 or bf16; bf16 halves HBM traffic).
      label_ids: (B, S)    integer array of target token ids.

    Returns dict with 'logits', 'label_ids', 'loss', 'PPL', 'sequence'.
    """
    assert token_tile % 16 == 0, "token_tile must pack for bf16/f32 sublanes"
    B, S, V = logits.shape
    N = B * S

    n_tok_tiles = pl.cdiv(N, token_tile)
    n_pad = n_tok_tiles * token_tile

    if V <= max_vocab_tile:
        vocab_tile, v_pad = V, V
    else:
        vocab_tile = max_vocab_tile                   # multiple of 128
        v_pad = pl.cdiv(V, vocab_tile) * vocab_tile
    n_voc_tiles = v_pad // vocab_tile

    logits_flat = logits.reshape(N, V)                # keep input dtype
    labels_flat = label_ids.reshape(N, 1).astype(jnp.int32)

    if n_pad != N:   # ragged token tail: pad and mask (label == -1)
        logits_flat = jnp.pad(logits_flat, ((0, n_pad - N), (0, 0)))
        labels_flat = jnp.pad(labels_flat, ((0, n_pad - N), (0, 0)),
                              constant_values=-1)
    if v_pad != V:   # ragged vocab tail: -inf never wins max / exp -> 0
        logits_flat = jnp.pad(logits_flat, ((0, 0), (0, v_pad - V)),
                              constant_values=float("-inf"))

    itemsize = jnp.dtype(logits_flat.dtype).itemsize
    cost = pl.CostEstimate(
        flops=int(6 * n_pad * v_pad),
        transcendentals=int(n_pad * v_pad),
        bytes_accessed=int(n_pad * v_pad * itemsize + n_pad * 4 * 3),
    )

    seq_rows, loss_parts = pl.pallas_call(
        _text_criterion_kernel,
        out_shape=(
            jax.ShapeDtypeStruct((1, n_pad), jnp.int32),           # argmax ids
            jax.ShapeDtypeStruct((n_tok_tiles, 1, 1), jnp.float32),  # partial NLL
        ),
        grid_spec=pltpu.PrefetchScalarGridSpec(
            num_scalar_prefetch=0,
            grid=(n_tok_tiles, n_voc_tiles),
            in_specs=[
                pl.BlockSpec((token_tile, vocab_tile), lambda i, k: (i, k)),
                pl.BlockSpec((token_tile, 1), lambda i, k: (i, 0)),
            ],
            out_specs=[
                pl.BlockSpec((1, token_tile), lambda i, k: (0, i)),
                pl.BlockSpec((1, 1, 1), lambda i, k: (i, 0, 0)),
            ],
            scratch_shapes=[
                pltpu.VMEM((token_tile, 1), jnp.float32),   # running max
                pltpu.VMEM((token_tile, 1), jnp.float32),   # running sum-exp
                pltpu.VMEM((token_tile, 1), jnp.float32),   # label logit
                pltpu.VMEM((token_tile, 1), jnp.int32),     # running argmax
            ],
        ),
        compiler_params=pltpu.CompilerParams(
            dimension_semantics=("parallel", "arbitrary"),
            vmem_limit_bytes=vmem_limit_bytes,
        ),
        cost_estimate=cost,
    )(logits_flat, labels_flat)

    # TODO(synk): the original TellingLoss may apply pad-token masking / label
    # shifting; here only the padded tail is masked and we take the plain mean
    # token-level cross-entropy over all B*S tokens.
    loss = jnp.sum(loss_parts) / jnp.float32(N)
    ppl = jnp.exp(loss)                       # Perplexity.update(loss) -> exp(mean NLL)
    sequence = seq_rows[0, :N].reshape(B, S)

    return {
        "logits": logits,
        "label_ids": label_ids,
        "loss": loss,
        "PPL": ppl,
        "sequence": sequence,
    }


def _reference(logits, label_ids):
    x = logits.astype(jnp.float32)
    logp = jax.nn.log_softmax(x, axis=-1)
    nll = -jnp.take_along_axis(logp, label_ids[..., None].astype(jnp.int32),
                               axis=-1)[..., 0]
    loss = jnp.mean(nll)
    return loss, jnp.argmax(x, axis=-1).astype(jnp.int32)


if __name__ == "__main__":
    key = jax.random.PRNGKey(0)
    k1, k2 = jax.random.split(key)

    B, S, V = 2, 8, 32
    # bf16 logits exercise the halved-HBM-traffic path; the kernel casts to f32.
    logits = jax.random.normal(k1, (B, S, V), dtype=jnp.float32).astype(jnp.bfloat16)
    label_ids = jax.random.randint(k2, (B, S), 0, V, dtype=jnp.int32)

    out = text_criterion_forward(logits, label_ids)
    jax.block_until_ready(out)

    ref_loss, ref_seq = _reference(logits, label_ids)
    assert jnp.allclose(out["loss"], ref_loss, atol=1e-3, rtol=1e-3), (
        out["loss"], ref_loss)
    assert jnp.array_equal(out["sequence"], ref_seq), (out["sequence"], ref_seq)
    assert jnp.allclose(out["PPL"], jnp.exp(ref_loss), atol=1e-2, rtol=1e-3)

    print("KERNEL_OK")
</pallas_src>

<mosaic_0001>
module attributes {stable_mosaic.version = 11 : i64} {
  func.func @_text_criterion_kernel(%arg0: i32, %arg1: i32, %arg2: memref<128x32xbf16, #tpu.memory_space<vmem>>, %arg3: memref<128x1xi32, #tpu.memory_space<vmem>>, %arg4: memref<1x128xi32, #tpu.memory_space<vmem>>, %arg5: memref<1x1x1xf32, #tpu.memory_space<vmem>>, %arg6: memref<128x1xf32, #tpu.memory_space<vmem>>, %arg7: memref<128x1xf32, #tpu.memory_space<vmem>>, %arg8: memref<128x1xf32, #tpu.memory_space<vmem>>, %arg9: memref<128x1xi32, #tpu.memory_space<vmem>>) attributes {dimension_semantics = [#tpu.dimension_semantics<parallel>, #tpu.dimension_semantics<arbitrary>], iteration_bounds = array<i64: 1, 1>, scalar_prefetch = 0 : i64, scratch_operands = 4 : i64, tpu.core_type = #tpu.core_type<tc>, window_params = [{transform_indices = @transform_0, window_bounds = array<i64: 128, 32>}, {transform_indices = @transform_1, window_bounds = array<i64: 128, 1>}, {transform_indices = @transform_2, window_bounds = array<i64: 1, 128>}, {transform_indices = @transform_3, window_bounds = array<i64: 1, 1, 1>}]} {
    %c0_i32 = arith.constant 0 : i32
    %0 = arith.cmpi eq, %arg1, %c0_i32 : i32
    %1 = arith.extui %0 : i1 to i32
    %c0_i32_0 = arith.constant 0 : i32
    %2 = arith.cmpi ne, %1, %c0_i32_0 : i32
    scf.if %2 {
      %cst_26 = arith.constant 0xFF800000 : f32
      %47 = vector.broadcast %cst_26 : f32 to vector<128x1xf32>
      %c0_27 = arith.constant 0 : index
      %c0_28 = arith.constant 0 : index
      %48 = vector.load %arg6[%c0_27, %c0_28] : memref<128x1xf32, #tpu.memory_space<vmem>>, vector<128x1xf32>
      tpu.vector_store %arg6[%c0_27, %c0_28], %47 {strides = array<i32>} : memref<128x1xf32, #tpu.memory_space<vmem>>, vector<128x1xf32>,
      %cst_29 = arith.constant 0.000000e+00 : f32
      %49 = vector.broadcast %cst_29 : f32 to vector<128x1xf32>
      %c0_30 = arith.constant 0 : index
      %c0_31 = arith.constant 0 : index
      %50 = vector.load %arg7[%c0_30, %c0_31] : memref<128x1xf32, #tpu.memory_space<vmem>>, vector<128x1xf32>
      tpu.vector_store %arg7[%c0_30, %c0_31], %49 {strides = array<i32>} : memref<128x1xf32, #tpu.memory_space<vmem>>, vector<128x1xf32>,
      %cst_32 = arith.constant 0.000000e+00 : f32
      %51 = vector.broadcast %cst_32 : f32 to vector<128x1xf32>
      %c0_33 = arith.constant 0 : index
      %c0_34 = arith.constant 0 : index
      %52 = vector.load %arg8[%c0_33, %c0_34] : memref<128x1xf32, #tpu.memory_space<vmem>>, vector<128x1xf32>
      tpu.vector_store %arg8[%c0_33, %c0_34], %51 {strides = array<i32>} : memref<128x1xf32, #tpu.memory_space<vmem>>, vector<128x1xf32>,
      %c0_i32_35 = arith.constant 0 : i32
      %53 = vector.broadcast %c0_i32_35 : i32 to vector<128x1xi32>
      %c0_36 = arith.constant 0 : index
      %c0_37 = arith.constant 0 : index
      %54 = vector.load %arg9[%c0_36, %c0_37] : memref<128x1xi32, #tpu.memory_space<vmem>>, vector<128x1xi32>
      tpu.vector_store %arg9[%c0_36, %c0_37], %53 {strides = array<i32>} : memref<128x1xi32, #tpu.memory_space<vmem>>, vector<128x1xi32>,
    } else {
    }
    %c0 = arith.constant 0 : index
    %c0_1 = arith.constant 0 : index
    %3 = vector.load %arg2[%c0, %c0_1] : memref<128x32xbf16, #tpu.memory_space<vmem>>, vector<128x32xbf16>
    %4 = arith.extf %3 : vector<128x32xbf16> to vector<128x32xf32>
    %c0_2 = arith.constant 0 : index
    %c0_3 = arith.constant 0 : index
    %5 = vector.load %arg3[%c0_2, %c0_3] : memref<128x1xi32, #tpu.memory_space<vmem>>, vector<128x1xi32>
    %6 = tpu.iota {dimensions = array<i32: 1>} : vector<128x32xi32>
    %c32_i32 = arith.constant 32 : i32
    %7 = arith.muli %arg1, %c32_i32 : i32
    %8 = vector.broadcast %7 : i32 to vector<128x32xi32>
    %9 = arith.addi %6, %8 : vector<128x32xi32>
    %cst = arith.constant dense<0xFF800000> : vector<128xf32>
    %10 = vector.multi_reduction <maximumf>, %4, %cst [1] : vector<128x32xf32> to vector<128xf32>
    %11 = vector.shape_cast %10 : vector<128xf32> to vector<128x1xf32>
    %12 = tpu.reduce_index %4 {axis = 1 : i32, kind = #tpu.reduction_kind<arg_max>} : vector<128x32xf32> -> vector<128xi32>
    %13 = vector.shape_cast %12 : vector<128xi32> to vector<128x1xi32>
    %c0_4 = arith.constant 0 : index
    %c0_5 = arith.constant 0 : index
    %14 = vector.load %arg6[%c0_4, %c0_5] : memref<128x1xf32, #tpu.memory_space<vmem>>, vector<128x1xf32>
    %15 = arith.maximumf %14, %11 : vector<128x1xf32>
    %c0_6 = arith.constant 0 : index
    %c0_7 = arith.constant 0 : index
    %16 = vector.load %arg7[%c0_6, %c0_7] : memref<128x1xf32, #tpu.memory_space<vmem>>, vector<128x1xf32>
    %17 = arith.subf %14, %15 : vector<128x1xf32>
    %18 = math.exp %17 : vector<128x1xf32>
    %19 = arith.mulf %16, %18 : vector<128x1xf32>
    %20 = vector.broadcast %15 : vector<128x1xf32> to vector<128x32xf32>
    %21 = arith.subf %4, %20 : vector<128x32xf32>
    %22 = math.exp %21 : vector<128x32xf32>
    %cst_8 = arith.constant dense<0.000000e+00> : vector<128xf32>
    %23 = vector.multi_reduction <add>, %22, %cst_8 [1] : vector<128x32xf32> to vector<128xf32>
    %24 = vector.shape_cast %23 : vector<128xf32> to vector<128x1xf32>
    %25 = arith.addf %19, %24 : vector<128x1xf32>
    %c0_9 = arith.constant 0 : index
    %c0_10 = arith.constant 0 : index
    %26 = vector.load %arg7[%c0_9, %c0_10] : memref<128x1xf32, #tpu.memory_space<vmem>>, vector<128x1xf32>
    tpu.vector_store %arg7[%c0_9, %c0_10], %25 {strides = array<i32>} : memref<128x1xf32, #tpu.memory_space<vmem>>, vector<128x1xf32>,
    %c0_11 = arith.constant 0 : index
    %c0_12 = arith.constant 0 : index
    %27 = vector.load %arg8[%c0_11, %c0_12] : memref<128x1xf32, #tpu.memory_space<vmem>>, vector<128x1xf32>
    %28 = vector.broadcast %5 : vector<128x1xi32> to vector<128x32xi32>
    %29 = arith.cmpi eq, %9, %28 : vector<128x32xi32>
    %cst_13 = arith.constant 0.000000e+00 : f32
    %30 = vector.broadcast %cst_13 : f32 to vector<128x32xf32>
    %31 = arith.select %29, %4, %30 : vector<128x32xi1>, vector<128x32xf32>
    %cst_14 = arith.constant dense<0.000000e+00> : vector<128xf32>
    %32 = vector.multi_reduction <add>, %31, %cst_14 [1] : vector<128x32xf32> to vector<128xf32>
    %33 = vector.shape_cast %32 : vector<128xf32> to vector<128x1xf32>
    %34 = arith.addf %27, %33 : vector<128x1xf32>
    %c0_15 = arith.constant 0 : index
    %c0_16 = arith.constant 0 : index
    %35 = vector.load %arg8[%c0_15, %c0_16] : memref<128x1xf32, #tpu.memory_space<vmem>>, vector<128x1xf32>
    tpu.vector_store %arg8[%c0_15, %c0_16], %34 {strides = array<i32>} : memref<128x1xf32, #tpu.memory_space<vmem>>, vector<128x1xf32>,
    %36 = arith.cmpf ogt, %11, %14 : vector<128x1xf32>
    %c32_i32_17 = arith.constant 32 : i32
    %37 = arith.muli %arg1, %c32_i32_17 : i32
    %38 = vector.broadcast %37 : i32 to vector<128x1xi32>
    %39 = arith.addi %13, %38 : vector<128x1xi32>
    %c0_18 = arith.constant 0 : index
    %c0_19 = arith.constant 0 : index
    %40 = vector.load %arg9[%c0_18, %c0_19] : memref<128x1xi32, #tpu.memory_space<vmem>>, vector<128x1xi32>
    %41 = arith.select %36, %39, %40 : vector<128x1xi1>, vector<128x1xi32>
    %c0_20 = arith.constant 0 : index
    %c0_21 = arith.constant 0 : index
    %42 = vector.load %arg9[%c0_20, %c0_21] : memref<128x1xi32, #tpu.memory_space<vmem>>, vector<128x1xi32>
    tpu.vector_store %arg9[%c0_20, %c0_21], %41 {strides = array<i32>} : memref<128x1xi32, #tpu.memory_space<vmem>>, vector<128x1xi32>,
    %c0_22 = arith.constant 0 : index
    %c0_23 = arith.constant 0 : index
    %43 = vector.load %arg6[%c0_22, %c0_23] : memref<128x1xf32, #tpu.memory_space<vmem>>, vector<128x1xf32>
    tpu.vector_store %arg6[%c0_22, %c0_23], %15 {strides = array<i32>} : memref<128x1xf32, #tpu.memory_space<vmem>>, vector<128x1xf32>,
    %c0_i32_24 = arith.constant 0 : i32
    %44 = arith.cmpi eq, %arg1, %c0_i32_24 : i32
    %45 = arith.extui %44 : i1 to i32
    %c0_i32_25 = arith.constant 0 : i32
    %46 = arith.cmpi ne, %45, %c0_i32_25 : i32
    scf.if %46 {
      %c0_26 = arith.constant 0 : index
      %c0_27 = arith.constant 0 : index
      %47 = vector.load %arg6[%c0_26, %c0_27] : memref<128x1xf32, #tpu.memory_space<vmem>>, vector<128x1xf32>
      %c0_28 = arith.constant 0 : index
      %c0_29 = arith.constant 0 : index
      %48 = vector.load %arg7[%c0_28, %c0_29] : memref<128x1xf32, #tpu.memory_space<vmem>>, vector<128x1xf32>
      %49 = math.log %48 : vector<128x1xf32>
      %50 = arith.addf %47, %49 : vector<128x1xf32>
      %c0_30 = arith.constant 0 : index
      %c0_31 = arith.constant 0 : index
      %51 = vector.load %arg8[%c0_30, %c0_31] : memref<128x1xf32, #tpu.memory_space<vmem>>, vector<128x1xf32>
      %52 = arith.subf %50, %51 : vector<128x1xf32>
      %c0_i32_32 = arith.constant 0 : i32
      %53 = vector.broadcast %c0_i32_32 : i32 to vector<128x1xi32>
      %54 = arith.cmpi sge, %5, %53 : vector<128x1xi32>
      %55 = arith.extui %54 : vector<128x1xi1> to vector<128x1xi32>
      %56 = arith.sitofp %55 : vector<128x1xi32> to vector<128x1xf32>
      %57 = arith.mulf %52, %56 : vector<128x1xf32>
      %cst_33 = arith.constant dense<0.000000e+00> : vector<1xf32>
      %58 = vector.multi_reduction <add>, %57, %cst_33 [0] : vector<128x1xf32> to vector<1xf32>
      %59 = vector.shape_cast %58 : vector<1xf32> to vector<1x1xf32>
      %60 = vector.shape_cast %59 : vector<1x1xf32> to vector<1x1x1xf32>
      %c0_34 = arith.constant 0 : index
      %c0_35 = arith.constant 0 : index
      %c0_36 = arith.constant 0 : index
      %61 = vector.load %arg5[%c0_34, %c0_35, %c0_36] : memref<1x1x1xf32, #tpu.memory_space<vmem>>, vector<1x1x1xf32>
      tpu.vector_store %arg5[%c0_34, %c0_35, %c0_36], %60 {strides = array<i32>} : memref<1x1x1xf32, #tpu.memory_space<vmem>>, vector<1x1x1xf32>,
      %c0_37 = arith.constant 0 : index
      %c0_38 = arith.constant 0 : index
      %62 = vector.load %arg9[%c0_37, %c0_38] : memref<128x1xi32, #tpu.memory_space<vmem>>, vector<128x1xi32>
      %63 = vector.shape_cast %62 : vector<128x1xi32> to vector<128xi32>
      %c0_39 = arith.constant 0 : index
      %c0_40 = arith.constant 0 : index
      %64 = vector.load %arg4[%c0_39, %c0_40] : memref<1x128xi32, #tpu.memory_space<vmem>>, vector<1x128xi32>
      %65 = vector.shape_cast %64 : vector<1x128xi32> to vector<128xi32>
      %66 = vector.shape_cast %63 : vector<128xi32> to vector<1x128xi32>
      tpu.vector_store %arg4[%c0_39, %c0_40], %66 {strides = array<i32>} : memref<1x128xi32, #tpu.memory_space<vmem>>, vector<1x128xi32>,
    } else {
    }
    return
  }
  func.func @transform_0(%arg0: i32, %arg1: i32) -> (i32, i32) {
    %c0_i32 = arith.constant 0 : i32
    return %arg0, %arg1 : i32, i32
  }
  func.func @transform_1(%arg0: i32, %arg1: i32) -> (i32, i32) {
    %c0_i32 = arith.constant 0 : i32
    %c0_i32_0 = arith.constant 0 : i32
    return %arg0, %c0_i32 : i32, i32
  }
  func.func @transform_2(%arg0: i32, %arg1: i32) -> (i32, i32) {
    %c0_i32 = arith.constant 0 : i32
    %c0_i32_0 = arith.constant 0 : i32
    return %c0_i32, %arg0 : i32, i32
  }
  func.func @transform_3(%arg0: i32, %arg1: i32) -> (i32, i32, i32) {
    %c0_i32 = arith.constant 0 : i32
    %c0_i32_0 = arith.constant 0 : i32
    %c0_i32_1 = arith.constant 0 : i32
    return %arg0, %c0_i32, %c0_i32_0 : i32, i32, i32
  }
}

</mosaic_0001>

<bundles_post_ra>
// kernel: tpu_custom_call.1
= control target key start
LH: loop header
LB: loop body
LE: loop exit
PB: predicated region body
PF: predicated region fallthrough
CT: control target
= control target key end

     0   :  { %9 = vsyncpa [#allocation7], 0  ;;  %vm137_vm0 = vcmask 261120   ;;  %s2214_s0 = inlined_call_operand.vmem [shape: bf16[128,32], index: 0, kind: input, shape index: {}]   ;;  %s2215_s1 = inlined_call_operand.vmem [shape: s32[128,1], index: 1, kind: input, shape index: {}]   ;;  %s2216_s2 = inlined_call_operand.hbm [shape: s32[1,128], index: 2, kind: output, shape index: {0}]   ;;  %s2217_s3 = inlined_call_operand.hbm [shape: f32[1,1,1], index: 3, kind: output, shape index: {1}]  }
   0x1   :  { %v1236_v0 = vld [vmem:[%s2214_s0 + $0x10] sm:$0xff]   ;;  %v1235_v1 = vld [vmem:[%s2214_s0 + $0x8] sm:$0xff]   ;;  %v1204_v2 = vld [vmem:[%s2214_s0] sm:$0xff]  }
   0x2   :  { %v1433_v3 = vunpack.c.l.bf16 %v1236_v0  ;;  %v1435_v4 = vunpack.c.l.bf16 %v1235_v1  ;;  %v1437_v5 = vunpack.c.l.bf16 %v1204_v2 }
   0x3   :  { %10 = vsyncpa [#allocation9], 0  ;;  %v1445_v9 = vunpack.c.h.bf16 %v1236_v0  ;;  %v1447_v10 = vunpack.c.h.bf16 %v1235_v1  ;;  %v1449_v11 = vunpack.c.h.bf16 %v1204_v2  ;;  %v1238_v15 = vld [vmem:[%s2214_s0 + $0x20] sm:$0xff]   ;;  %v1237_v16 = vld [vmem:[%s2214_s0 + $0x18] sm:$0xff]   ;;  %vm19_vm1 = vcmask 7168   ;;  %s1173_s9 = sshll.u32 %s2217_s3, 4  ;;  %s1174_s9 = int_to_ptr.hbm [resolvable:$true] %s1173_s9 }
   0x4   :  { %v150_v6 = vsel %vm137_vm0, %v1433_v3, -inf  ;;  %v144_v7 = vsel %vm137_vm0, %v1435_v4, -inf  ;;  %v138_v8 = vsel %vm137_vm0, %v1437_v5, -inf  ;;  %v1463_v17 = vunpack.c.l.bf16 %v1238_v15  ;;  %v1239_v23 = vld [vmem:[%s2214_s0 + $0x28] sm:$0xff]   ;;  %v1241_v30 = vld [vmem:[%s2214_s0 + $0x38] sm:$0xff]   ;;  %v1240_v31 = vld [vmem:[%s2214_s0 + $0x30] sm:$0xff]  }
   0x5   :  { %151 = vmax.xlane.f32.xlu2 %v150_v6  ;;  %145 = vmax.xlane.f32.xlu1 %v144_v7  ;;  %v153_v12 = vsel %vm137_vm0, %v1445_v9, -inf  ;;  %v147_v13 = vsel %vm137_vm0, %v1447_v10, -inf  ;;  %v141_v14 = vsel %vm137_vm0, %v1449_v11, -inf  ;;  %v1465_v18 = vunpack.c.h.bf16 %v1237_v16  ;;  %s1403_s3 = smov [#allocation6]   ;;  %s1162_s13 = sshll.u32 %s2216_s2, 4  ;;  %s1163_s13 = int_to_ptr.hbm [resolvable:$true] %s1162_s13 }
   0x6   :  { %139 = vmax.xlane.f32.xlu0 %v138_v8  ;;  %v1467_v19 = vunpack.c.l.bf16 %v1237_v16  ;;  %v162_v20 = vsel %vm137_vm0, %v1463_v17, -inf  ;;  %v1478_v24 = vunpack.c.h.bf16 %v1239_v23  ;;  %v1480_v25 = vunpack.c.l.bf16 %v1239_v23  ;;  %s1160_s10 = sshll.u32 %s1403_s3, 4  ;;  %s1161_s10 = int_to_ptr.vmem [resolvable:$true] %s1160_s10 }
   0x7   :  { %v159_v21 = vsel %vm137_vm0, %v1465_v18, -inf  ;;  %v1482_v26 = vunpack.c.h.bf16 %v1238_v15  ;;  %v1496_v32 = vunpack.c.l.bf16 %v1241_v30  ;;  %v1498_v33 = vunpack.c.h.bf16 %v1240_v31 }
   0x8   :  { %v156_v22 = vsel %vm137_vm0, %v1467_v19, -inf  ;;  %v171_v27 = vsel %vm137_vm0, %v1478_v24, -inf  ;;  %v168_v28 = vsel %vm137_vm0, %v1480_v25, -inf  ;;  %v1500_v34 = vunpack.c.l.bf16 %v1240_v31 }
   0x9   :  { %v165_v29 = vsel %vm137_vm0, %v1482_v26, -inf  ;;  %v180_v35 = vsel %vm137_vm0, %v1496_v32, -inf  ;;  %v177_v36 = vsel %vm137_vm0, %v1498_v33, -inf  ;;  %v1508_v38 = vunpack.c.h.bf16 %v1241_v30 }
   0xa   :  { %v174_v37 = vsel %vm137_vm0, %v1500_v34, -inf  ;;  %v1399_v40 = vmov -inf   ;;  %v1400_v41 = vmov 0   ;;  %v2219_v42 = vmov 0.0  }
   0xb   :  { %v183_v39 = vsel %vm137_vm0, %v1508_v38, -inf  ;;  %24 = vst.msk [vmem:[#allocation2 + $0x20] sm:$0xff] %vm19_vm1, %v1399_v40  ;;  %1249 = vset.pattern.permute.xlu1 %v1400_v41  ;;  %1247 = vset.pattern.permute.xlu2 %v1400_v41 }
   0xc   :  { %20 = vst.msk [vmem:[#allocation2] sm:$0xff] %vm19_vm1, %v1399_v40  ;;  %1248 = vset.pattern.permute.xlu0 %v1400_v41 }
   0xd   :  { %154 = vmax.xlane.f32.xlu2 %v153_v12  ;;  %148 = vmax.xlane.f32.xlu1 %v147_v13  ;;  %21 = vst.msk [vmem:[#allocation2 + $0x8] sm:$0xff] %vm19_vm1, %v1399_v40 }
   0xe   :  { %142 = vmax.xlane.f32.xlu0 %v141_v14  ;;  %22 = vst.msk [vmem:[#allocation2 + $0x10] sm:$0xff] %vm19_vm1, %v1399_v40 }
   0xf   :  { %23 = vst.msk [vmem:[#allocation2 + $0x18] sm:$0xff] %vm19_vm1, %v1399_v40 }
  0x10   :  { %25 = vst.msk [vmem:[#allocation2 + $0x28] sm:$0xff] %vm19_vm1, %v1399_v40 }
  0x11   :  { %26 = vst.msk [vmem:[#allocation2 + $0x30] sm:$0xff] %vm19_vm1, %v1399_v40 }
  0x12   :  { %27 = vst.msk [vmem:[#allocation2 + $0x38] sm:$0xff] %vm19_vm1, %v1399_v40  ;;  %v1552_v43 = vld [vmem:[#allocation2 + $0x20] sm:$0xff] }
  0x13   :  { %28 = vst.msk [vmem:[#allocation2 + $0x40] sm:$0xff] %vm19_vm1, %v1399_v40  ;;  %v1558_v45 = vld [vmem:[#allocation2] sm:$0xff] }
  0x14   :  { %29 = vst.msk [vmem:[#allocation2 + $0x48] sm:$0xff] %vm19_vm1, %v1399_v40  ;;  %v1606_v57 = vld [vmem:[#allocation2 + $0x8] sm:$0xff] }
  0x15   :  { %163 = vmax.xlane.f32.xlu2 %v162_v20  ;;  %160 = vmax.xlane.f32.xlu1 %v159_v21  ;;  %30 = vst.msk [vmem:[#allocation2 + $0x50] sm:$0xff] %vm19_vm1, %v1399_v40  ;;  %v1554_v44 = vld [vmem:[#allocation2 + $0x10] sm:$0xff] }
  0x16   :  { %157 = vmax.xlane.f32.xlu0 %v156_v22  ;;  %31 = vst.msk [vmem:[#allocation2 + $0x58] sm:$0xff] %vm19_vm1, %v1399_v40  ;;  %v1602_v56 = vld [vmem:[#allocation2 + $0x18] sm:$0xff] }
  0x17   :  { %32 = vst.msk [vmem:[#allocation2 + $0x60] sm:$0xff] %vm19_vm1, %v1399_v40  ;;  %v1600_v55 = vld [vmem:[#allocation2 + $0x28] sm:$0xff] }
  0x18   :  { %33 = vst.msk [vmem:[#allocation2 + $0x68] sm:$0xff] %vm19_vm1, %v1399_v40 }
  0x19   :  { %34 = vst.msk [vmem:[#allocation2 + $0x70] sm:$0xff] %vm19_vm1, %v1399_v40 }
  0x1a   :  { %35 = vst.msk [vmem:[#allocation2 + $0x78] sm:$0xff] %vm19_vm1, %v1399_v40 }
  0x1b   :  { %68 = vst.msk [vmem:[#allocation5] sm:$0xff] %vm19_vm1, %v1400_v41 }
  0x1c   :  { %69 = vst.msk [vmem:[#allocation5 + $0x8] sm:$0xff] %vm19_vm1, %v1400_v41 }
  0x1d   :  { %172 = vmax.xlane.f32.xlu2 %v171_v27  ;;  %169 = vmax.xlane.f32.xlu1 %v168_v28  ;;  %70 = vst.msk [vmem:[#allocation5 + $0x10] sm:$0xff] %vm19_vm1, %v1400_v41 }
  0x1e   :  { %166 = vmax.xlane.f32.xlu0 %v165_v29  ;;  %71 = vst.msk [vmem:[#allocation5 + $0x18] sm:$0xff] %vm19_vm1, %v1400_v41 }
  0x1f   :  { %72 = vst.msk [vmem:[#allocation5 + $0x20] sm:$0xff] %vm19_vm1, %v1400_v41  ;;  %v1749_v0 = vld [vmem:[#allocation2 + $0x68] sm:$0xff] }
  0x20   :  { %73 = vst.msk [vmem:[#allocation5 + $0x28] sm:$0xff] %vm19_vm1, %v1400_v41  ;;  %v1747_v40 = vld [vmem:[#allocation2 + $0x70] sm:$0xff] }
  0x21   :  { %74 = vst.msk [vmem:[#allocation5 + $0x30] sm:$0xff] %vm19_vm1, %v1400_v41  ;;  %v1798_v54 = vld [vmem:[#allocation2 + $0x78] sm:$0xff] }
  0x22   :  { %75 = vst.msk [vmem:[#allocation5 + $0x38] sm:$0xff] %vm19_vm1, %v1400_v41 }
  0x23   :  { %76 = vst.msk [vmem:[#allocation5 + $0x40] sm:$0xff] %vm19_vm1, %v1400_v41  ;;  %v748_v1 = vld [vmem:[#allocation5 + $0x8] sm:$0xff] }
  0x24   :  { %77 = vst.msk [vmem:[#allocation5 + $0x48] sm:$0xff] %vm19_vm1, %v1400_v41 }
  0x25   :  { %181 = vmax.xlane.f32.xlu2 %v180_v35  ;;  %178 = vmax.xlane.f32.xlu1 %v177_v36  ;;  %78 = vst.msk [vmem:[#allocation5 + $0x50] sm:$0xff] %vm19_vm1, %v1400_v41 }
  0x26   :  { %175 = vmax.xlane.f32.xlu0 %v174_v37  ;;  %79 = vst.msk [vmem:[#allocation5 + $0x58] sm:$0xff] %vm19_vm1, %v1400_v41 }
  0x27   :  { %80 = vst.msk [vmem:[#allocation5 + $0x60] sm:$0xff] %vm19_vm1, %v1400_v41 }
  0x28   :  { %81 = vst.msk [vmem:[#allocation5 + $0x68] sm:$0xff] %vm19_vm1, %v1400_v41 }
  0x29   :  { %82 = vst.msk [vmem:[#allocation5 + $0x70] sm:$0xff] %vm19_vm1, %v1400_v41 }
  0x2a   :  { %83 = vst.msk [vmem:[#allocation5 + $0x78] sm:$0xff] %vm19_vm1, %v1400_v41  ;;  %v1753_v41 = vld [vmem:[#allocation2 + $0x60] sm:$0xff] }
  0x2b   :  { %36 = vst.msk [vmem:[#allocation3] sm:$0xff] %vm19_vm1, %v2219_v42 }
  0x2c   :  { %37 = vst.msk [vmem:[#allocation3 + $0x8] sm:$0xff] %vm19_vm1, %v2219_v42 }
  0x2d   :  { %188 = vmax.index.xlane.f32.xlu2 %v141_v14  ;;  %186 = vmax.index.xlane.f32.xlu1 %v138_v8  ;;  %38 = vst.msk [vmem:[#allocation3 + $0x10] sm:$0xff] %vm19_vm1, %v2219_v42  ;;  %v1655_v8 = vld [vmem:[#allocation2 + $0x30] sm:$0xff] }
  0x2e   :  { %184 = vmax.xlane.f32.xlu0 %v183_v39  ;;  %39 = vst.msk [vmem:[#allocation3 + $0x18] sm:$0xff] %vm19_vm1, %v2219_v42 }
  0x2f   :  { %40 = vst.msk [vmem:[#allocation3 + $0x20] sm:$0xff] %vm19_vm1, %v2219_v42 }
  0x30   :  { %41 = vst.msk [vmem:[#allocation3 + $0x28] sm:$0xff] %vm19_vm1, %v2219_v42 }
  0x31   :  { %42 = vst.msk [vmem:[#allocation3 + $0x30] sm:$0xff] %vm19_vm1, %v2219_v42 }
  0x32   :  { %43 = vst.msk [vmem:[#allocation3 + $0x38] sm:$0xff] %vm19_vm1, %v2219_v42 }
  0x33   :  { %44 = vst.msk [vmem:[#allocation3 + $0x40] sm:$0xff] %vm19_vm1, %v2219_v42 }
  0x34   :  { %45 = vst.msk [vmem:[#allocation3 + $0x48] sm:$0xff] %vm19_vm1, %v2219_v42 }
  0x35   :  { %194 = vmax.index.xlane.f32.xlu2 %v150_v6  ;;  %192 = vmax.index.xlane.f32.xlu1 %v147_v13  ;;  %46 = vst.msk [vmem:[#allocation3 + $0x50] sm:$0xff] %vm19_vm1, %v2219_v42  ;;  %v1649_v6 = vld [vmem:[#allocation2 + $0x40] sm:$0xff] }
  0x36   :  { %190 = vmax.index.xlane.f32.xlu0 %v144_v7  ;;  %47 = vst.msk [vmem:[#allocation3 + $0x58] sm:$0xff] %vm19_vm1, %v2219_v42  ;;  %v1651_v7 = vld [vmem:[#allocation2 + $0x38] sm:$0xff] }
  0x37   :  { %48 = vst.msk [vmem:[#allocation3 + $0x60] sm:$0xff] %vm19_vm1, %v2219_v42 }
  0x38   :  { %49 = vst.msk [vmem:[#allocation3 + $0x68] sm:$0xff] %vm19_vm1, %v2219_v42 }
  0x39   :  { %50 = vst.msk [vmem:[#allocation3 + $0x70] sm:$0xff] %vm19_vm1, %v2219_v42 }
  0x3a   :  { %51 = vst.msk [vmem:[#allocation3 + $0x78] sm:$0xff] %vm19_vm1, %v2219_v42 }
  0x3b   :  { %52 = vst.msk [vmem:[#allocation4] sm:$0xff] %vm19_vm1, %v2219_v42 }
  0x3c   :  { %53 = vst.msk [vmem:[#allocation4 + $0x8] sm:$0xff] %vm19_vm1, %v2219_v42 }
  0x3d   :  { %200 = vmax.index.xlane.f32.xlu2 %v159_v21  ;;  %198 = vmax.index.xlane.f32.xlu1 %v156_v22  ;;  %54 = vst.msk [vmem:[#allocation4 + $0x10] sm:$0xff] %vm19_vm1, %v2219_v42 }
  0x3e   :  { %196 = vmax.index.xlane.f32.xlu0 %v153_v12  ;;  %55 = vst.msk [vmem:[#allocation4 + $0x18] sm:$0xff] %vm19_vm1, %v2219_v42 }
  0x3f   :  { %56 = vst.msk [vmem:[#allocation4 + $0x20] sm:$0xff] %vm19_vm1, %v2219_v42 }
  0x40   :  { %57 = vst.msk [vmem:[#allocation4 + $0x28] sm:$0xff] %vm19_vm1, %v2219_v42 }
  0x41   :  { %58 = vst.msk [vmem:[#allocation4 + $0x30] sm:$0xff] %vm19_vm1, %v2219_v42 }
  0x42   :  { %59 = vst.msk [vmem:[#allocation4 + $0x38] sm:$0xff] %vm19_vm1, %v2219_v42 }
  0x43   :  { %60 = vst.msk [vmem:[#allocation4 + $0x40] sm:$0xff] %vm19_vm1, %v2219_v42 }
  0x44   :  { %61 = vst.msk [vmem:[#allocation4 + $0x48] sm:$0xff] %vm19_vm1, %v2219_v42 }
  0x45   :  { %206 = vmax.index.xlane.f32.xlu2 %v168_v28  ;;  %204 = vmax.index.xlane.f32.xlu1 %v165_v29  ;;  %v1700_v28 = vld [vmem:[#allocation2 + $0x50] sm:$0xff]  ;;  %v1704_v29 = vld [vmem:[#allocation2 + $0x48] sm:$0xff]  ;;  %62 = vst.msk [vmem:[#allocation4 + $0x50] sm:$0xff] %vm19_vm1, %v2219_v42 }
  0x46   :  { %202 = vmax.index.xlane.f32.xlu0 %v162_v20  ;;  %63 = vst.msk [vmem:[#allocation4 + $0x58] sm:$0xff] %vm19_vm1, %v2219_v42 }
  0x47   :  { %64 = vst.msk [vmem:[#allocation4 + $0x60] sm:$0xff] %vm19_vm1, %v2219_v42  ;;  %v747_v42 = vld [vmem:[#allocation5] sm:$0xff] }
  0x4d   :  { %212 = vmax.index.xlane.f32.xlu2 %v177_v36  ;;  %210 = vmax.index.xlane.f32.xlu1 %v174_v37 }
  0x4e   :  { %208 = vmax.index.xlane.f32.xlu0 %v171_v27  ;;  %v1698_v27 = vld [vmem:[#allocation2 + $0x58] sm:$0xff] }
  0x55   :  { %216 = vmax.index.xlane.f32.xlu1 %v183_v39 }
  0x56   :  { %214 = vmax.index.xlane.f32.xlu0 %v180_v35 }
  0x78   :  { %v1562_v46 = vpop.xlane.xlu2 %151  ;;  %v1564_v47 = vpop.xlane.xlu1 %145 }
  0x79   :  { %v1570_v48 = vmax.f32 %v1552_v43, %v1562_v46  ;;  %v1574_v49 = vmax.f32 %v1554_v44, %v1564_v47  ;;  %v1576_v50 = vpop.xlane.xlu0 %139  ;;  %vm719_vm4 = vcmp.gt.f32.partialorder %v1562_v46, %v1552_v43  ;;  %vm717_vm6 = vcmp.gt.f32.partialorder %v1564_v47, %v1554_v44  ;;  %v754_v46 = vld [vmem:[#allocation5 + $0x38] sm:$0xff]  ;;  %v753_v47 = vld [vmem:[#allocation5 + $0x30] sm:$0xff] }
  0x7a   :  { %v1582_v51 = vmax.f32 %v1558_v45, %v1576_v50  ;;  %vm715_vm2 = vcmp.gt.f32.partialorder %v1576_v50, %v1558_v45  ;;  %v1816_v50 = vld [vmem:[%s2215_s1 + $0x8] sm:$0xff] }
  0x7b   :  { %799 = vst.msk [vmem:[#allocation2 + $0x20] sm:$0xff] %vm19_vm1, %v1570_v48  ;;  %342 = vperm.xlu1 %1249, %v1574_v49  }
  0x7c   :  { %797 = vst.msk [vmem:[#allocation2 + $0x10] sm:$0xff] %vm19_vm1, %v1574_v49  ;;  %332 = vperm.xlu2 %1247, %v1582_v51  }
  0x7d   :  { %795 = vst.msk [vmem:[#allocation2] sm:$0xff] %vm19_vm1, %v1582_v51 }
  0x7e   :  { %2246 = vst [vmem:[#allocation20_spill] sm:$0xff] %v1816_v50 }
  0x80   :  { %v1610_v58 = vpop.xlane.xlu2 %154  ;;  %v1612_v59 = vpop.xlane.xlu1 %148 }
  0x81   :  { %v1618_v60 = vmax.f32 %v1600_v55, %v1610_v58  ;;  %v1622_v61 = vmax.f32 %v1602_v56, %v1612_v59  ;;  %v1624_v62 = vpop.xlane.xlu0 %142  ;;  %vm718_vm5 = vcmp.gt.f32.partialorder %v1612_v59, %v1602_v56  ;;  %v752_v59 = vld [vmem:[#allocation5 + $0x28] sm:$0xff]  ;;  %vm720_vm9 = vcmp.gt.f32.partialorder %v1610_v58, %v1600_v55  ;;  %v755_v58 = vld [vmem:[#allocation5 + $0x40] sm:$0xff] }
  0x82   :  { %v1630_v63 = vmax.f32 %v1606_v57, %v1624_v62  ;;  %vm716_vm3 = vcmp.gt.f32.partialorder %v1624_v62, %v1606_v57 }
  0x83   :  { %2237 = vst [vmem:[#allocation12_spill] sm:$0xff] %v1618_v60  ;;  %357 = vperm.xlu1 %1249, %v1618_v60  }
  0x84   :  { %800 = vst.msk [vmem:[#allocation2 + $0x28] sm:$0xff] %vm19_vm1, %v1618_v60  ;;  %337 = vperm.xlu0 %1248, %v1630_v63   ;;  %347 = vperm.xlu2 %1247, %v1622_v61  }
  0x85   :  { %798 = vst.msk [vmem:[#allocation2 + $0x18] sm:$0xff] %vm19_vm1, %v1622_v61 }
  0x86   :  { %796 = vst.msk [vmem:[#allocation2 + $0x8] sm:$0xff] %vm19_vm1, %v1630_v63 }
  0x88   :  { %v1659_v12 = vpop.xlane.xlu2 %163  ;;  %v1661_v13 = vpop.xlane.xlu1 %160 }
  0x89   :  { %v1667_v14 = vmax.f32 %v1649_v6, %v1659_v12  ;;  %v1671_v15 = vmax.f32 %v1651_v7, %v1661_v13  ;;  %v1673_v16 = vpop.xlane.xlu0 %157  ;;  %vm722_vm7 = vcmp.gt.f32.partialorder %v1661_v13, %v1651_v7  ;;  %v757_v13 = vld [vmem:[#allocation5 + $0x50] sm:$0xff]  ;;  %vm723_vm12 = vcmp.gt.f32.partialorder %v1659_v12, %v1649_v6  ;;  %v758_v12 = vld [vmem:[#allocation5 + $0x58] sm:$0xff] }
  0x8a   :  { %v1679_v20 = vmax.f32 %v1655_v8, %v1673_v16  ;;  %vm721_vm8 = vcmp.gt.f32.partialorder %v1673_v16, %v1655_v8  ;;  %v756_v16 = vld [vmem:[#allocation5 + $0x48] sm:$0xff] }
  0x8b   :  { %2238 = vst [vmem:[#allocation13_spill] sm:$0xff] %v1667_v14  ;;  %367 = vperm.xlu1 %1249, %v1671_v15  }
  0x8c   :  { %2239 = vst [vmem:[#allocation14_spill] sm:$0xff] %v1671_v15  ;;  %372 = vperm.xlu0 %1248, %v1667_v14   ;;  %352 = vperm.xlu2 %1247, %v1570_v48  }
  0x8d   :  { %803 = vst.msk [vmem:[#allocation2 + $0x40] sm:$0xff] %vm19_vm1, %v1667_v14  ;;  %v2245_v14 = vmov 0.0  }
  0x8e   :  { %802 = vst.msk [vmem:[#allocation2 + $0x38] sm:$0xff] %vm19_vm1, %v1671_v15 }
  0x8f   :  { %801 = vst.msk [vmem:[#allocation2 + $0x30] sm:$0xff] %vm19_vm1, %v1679_v20 }
  0x90   :  { %v1708_v30 = vpop.xlane.xlu2 %172  ;;  %v1710_v31 = vpop.xlane.xlu1 %169  ;;  %65 = vst.msk [vmem:[#allocation4 + $0x68] sm:$0xff] %vm19_vm1, %v2245_v14 }
  0x91   :  { %v1716_v35 = vmax.f32 %v1698_v27, %v1708_v30  ;;  %v1720_v36 = vmax.f32 %v1700_v28, %v1710_v31  ;;  %v1722_v37 = vpop.xlane.xlu0 %166  ;;  %66 = vst.msk [vmem:[#allocation4 + $0x70] sm:$0xff] %vm19_vm1, %v2245_v14  ;;  %vm725_vm10 = vcmp.gt.f32.partialorder %v1710_v31, %v1700_v28  ;;  %v760_v31 = vld [vmem:[#allocation5 + $0x68] sm:$0xff]  ;;  %vm726_vm15 = vcmp.gt.f32.partialorder %v1708_v30, %v1698_v27 }
  0x92   :  { %v1728_v39 = vmax.f32 %v1704_v29, %v1722_v37  ;;  %67 = vst.msk [vmem:[#allocation4 + $0x78] sm:$0xff] %vm19_vm1, %v2245_v14  ;;  %vm724_vm11 = vcmp.gt.f32.partialorder %v1722_v37, %v1704_v29  ;;  %v759_v37 = vld [vmem:[#allocation5 + $0x60] sm:$0xff] }
  0x93   :  { %2240 = vst [vmem:[#allocation15_spill] sm:$0xff] %v1716_v35  ;;  %382 = vperm.xlu1 %1249, %v1720_v36  }
  0x94   :  { %2241 = vst [vmem:[#allocation16_spill] sm:$0xff] %v1720_v36  ;;  %387 = vperm.xlu0 %1248, %v1716_v35   ;;  %362 = vperm.xlu2 %1247, %v1679_v20  }
  0x95   :  { %806 = vst.msk [vmem:[#allocation2 + $0x58] sm:$0xff] %vm19_vm1, %v1716_v35 }
  0x96   :  { %805 = vst.msk [vmem:[#allocation2 + $0x50] sm:$0xff] %vm19_vm1, %v1720_v36 }
  0x97   :  { %804 = vst.msk [vmem:[#allocation2 + $0x48] sm:$0xff] %vm19_vm1, %v1728_v39 }
  0x98   :  { %v1757_v22 = vpop.xlane.xlu2 %181  ;;  %v1759_v21 = vpop.xlane.xlu1 %178 }
  0x99   :  { %v1765_v2 = vmax.f32 %v1747_v40, %v1757_v22  ;;  %v1769_v52 = vmax.f32 %v1749_v0, %v1759_v21  ;;  %v1771_v23 = vpop.xlane.xlu0 %175  ;;  %vm728_vm13 = vcmp.gt.f32.partialorder %v1759_v21, %v1749_v0  ;;  %v761_v21 = vld [vmem:[#allocation5 + $0x70] sm:$0xff] }
  0x9a   :  { %v1777_v53 = vmax.f32 %v1753_v41, %v1771_v23  ;;  %vm727_vm14 = vcmp.gt.f32.partialorder %v1771_v23, %v1753_v41 }
  0x9b   :  { %2242 = vst [vmem:[#allocation17_spill] sm:$0xff] %v1765_v2  ;;  %397 = vperm.xlu1 %1249, %v1769_v52  }
  0x9c   :  { %2243 = vst [vmem:[#allocation18_spill] sm:$0xff] %v1769_v52  ;;  %402 = vperm.xlu0 %1248, %v1765_v2   ;;  %377 = vperm.xlu2 %1247, %v1728_v39  }
  0x9d   :  { %2244 = vst [vmem:[#allocation19_spill] sm:$0xff] %v1777_v53 }
  0x9e   :  { %809 = vst.msk [vmem:[#allocation2 + $0x70] sm:$0xff] %vm19_vm1, %v1765_v2 }
  0x9f   :  { %808 = vst.msk [vmem:[#allocation2 + $0x68] sm:$0xff] %vm19_vm1, %v1769_v52  ;;  %v118_v52 = vld [vmem:[%s2215_s1 + $0x10] sm:$0xff] }
  0xa0   :  { %807 = vst.msk [vmem:[#allocation2 + $0x60] sm:$0xff] %vm19_vm1, %v1777_v53  ;;  %v189_v35 = vpop.xlane.xlu2 %188  ;;  %v187_v2 = vpop.xlane.xlu1 %186 }
  0xa1   :  { %v764_v36 = vsel %vm716_vm3, %v189_v35, %v748_v1  ;;  %v763_v60 = vsel %vm715_vm2, %v187_v2, %v747_v42  ;;  %v1811_v15 = vpop.xlane.xlu0 %184  ;;  %v751_v42 = vld [vmem:[#allocation5 + $0x20] sm:$0xff]  ;;  %v750_v2 = vld [vmem:[#allocation5 + $0x18] sm:$0xff]  ;;  %v749_v35 = vld [vmem:[#allocation5 + $0x10] sm:$0xff]  ;;  %vm729_vm3 = vcmp.gt.f32.partialorder %v1757_v22, %v1747_v40 }
  0xa2   :  { %780 = vst.msk [vmem:[#allocation5 + $0x8] sm:$0xff] %vm19_vm1, %v764_v36  ;;  %v1821_v62 = vmax.f32 %v1798_v54, %v1811_v15  ;;  %vm730_vm2 = vcmp.gt.f32.partialorder %v1811_v15, %v1798_v54 }
  0xa3   :  { %779 = vst.msk [vmem:[#allocation5] sm:$0xff] %vm19_vm1, %v763_v60  ;;  %562 = vperm.xlu1 %1249, %v118_v52  }
  0xa4   :  { %810 = vst.msk [vmem:[#allocation2 + $0x78] sm:$0xff] %vm19_vm1, %v1821_v62  ;;  %559 = vperm.xlu0 %1248, %v1816_v50   ;;  %392 = vperm.xlu2 %1247, %v1777_v53   ;;  %v1839_v50 = vld [vmem:[%s2215_s1 + $0x18] sm:$0xff] }
  0xa8   :  { %v195_v52 = vpop.xlane.xlu2 %194  ;;  %v193_v60 = vpop.xlane.xlu1 %192 }
  0xa9   :  { %v767_v36 = vsel %vm719_vm4, %v195_v52, %v751_v42  ;;  %v766_v1 = vsel %vm718_vm5, %v193_v60, %v750_v2  ;;  %v191_v14 = vpop.xlane.xlu0 %190 }
  0xaa   :  { %783 = vst.msk [vmem:[#allocation5 + $0x20] sm:$0xff] %vm19_vm1, %v767_v36  ;;  %v765_v53 = vsel %vm717_vm6, %v191_v14, %v749_v35  ;;  %v1855_v35 = vld [vmem:[%s2215_s1] sm:$0xff] }
  0xab   :  { %782 = vst.msk [vmem:[#allocation5 + $0x18] sm:$0xff] %vm19_vm1, %v766_v1 }
  0xac   :  { %781 = vst.msk [vmem:[#allocation5 + $0x10] sm:$0xff] %vm19_vm1, %v765_v53  ;;  %565 = vperm.xlu0 %1248, %v1839_v50   ;;  %407 = vperm.xlu2 %1247, %v1821_v62  }
  0xb0   :  { %v201_v42 = vpop.xlane.xlu2 %200  ;;  %v199_v2 = vpop.xlane.xlu1 %198 }
  0xb1   :  { %v770_v14 = vsel %vm722_vm7, %v201_v42, %v754_v46  ;;  %v769_v53 = vsel %vm721_vm8, %v199_v2, %v753_v47  ;;  %v197_v1 = vpop.xlane.xlu0 %196  ;;  %v1870_v42 = vld [vmem:[%s2215_s1 + $0x20] sm:$0xff] }
  0xb2   :  { %786 = vst.msk [vmem:[#allocation5 + $0x38] sm:$0xff] %vm19_vm1, %v770_v14  ;;  %v768_v52 = vsel %vm720_vm9, %v197_v1, %v752_v59 }
  0xb3   :  { %785 = vst.msk [vmem:[#allocation5 + $0x30] sm:$0xff] %vm19_vm1, %v769_v53 }
  0xb4   :  { %784 = vst.msk [vmem:[#allocation5 + $0x28] sm:$0xff] %vm19_vm1, %v768_v52  ;;  %556 = vperm.xlu2 %1247, %v1855_v35  }
  0xb8   :  { %v207_v60 = vpop.xlane.xlu2 %206  ;;  %v205_v36 = vpop.xlane.xlu1 %204 }
  0xb9   :  { %v773_v46 = vsel %vm725_vm10, %v207_v60, %v757_v13  ;;  %v772_v47 = vsel %vm724_vm11, %v205_v36, %v756_v16  ;;  %v203_v59 = vpop.xlane.xlu0 %202 }
  0xba   :  { %789 = vst.msk [vmem:[#allocation5 + $0x50] sm:$0xff] %vm19_vm1, %v773_v46  ;;  %v771_v2 = vsel %vm723_vm12, %v203_v59, %v755_v58  ;;  %v762_v58 = vld [vmem:[#allocation5 + $0x78] sm:$0xff] }
  0xbb   :  { %788 = vst.msk [vmem:[#allocation5 + $0x48] sm:$0xff] %vm19_vm1, %v772_v47 }
  0xbc   :  { %787 = vst.msk [vmem:[#allocation5 + $0x40] sm:$0xff] %vm19_vm1, %v771_v2  ;;  %568 = vperm.xlu2 %1247, %v1870_v42  }
  0xc0   :  { %v213_v14 = vpop.xlane.xlu2 %212  ;;  %v211_v53 = vpop.xlane.xlu1 %210 }
  0xc1   :  { %v776_v1 = vsel %vm728_vm13, %v213_v14, %v760_v31  ;;  %v775_v52 = vsel %vm727_vm14, %v211_v53, %v759_v37  ;;  %v209_v13 = vpop.xlane.xlu0 %208 }
  0xc2   :  { %792 = vst.msk [vmem:[#allocation5 + $0x68] sm:$0xff] %vm19_vm1, %v776_v1  ;;  %v774_v16 = vsel %vm726_vm15, %v209_v13, %v758_v12 }
  0xc3   :  { %791 = vst.msk [vmem:[#allocation5 + $0x60] sm:$0xff] %vm19_vm1, %v775_v52 }
  0xc4   :  { %790 = vst.msk [vmem:[#allocation5 + $0x58] sm:$0xff] %vm19_vm1, %v774_v16 }
  0xc8   :  { %v217_v23 = vpop.xlane.xlu1 %216 }
  0xc9   :  { %v778_v30 = vsel %vm730_vm2, %v217_v23, %v762_v58  ;;  %v215_v60 = vpop.xlane.xlu0 %214 }
  0xca   :  { %794 = vst.msk [vmem:[#allocation5 + $0x78] sm:$0xff] %vm19_vm1, %v778_v30  ;;  %v777_v36 = vsel %vm729_vm3, %v215_v60, %v761_v21 }
  0xcb   :  { %793 = vst.msk [vmem:[#allocation5 + $0x70] sm:$0xff] %vm19_vm1, %v777_v36 }
  0xd6   :  { %v333_v46 = vpop.permute.xlu2 %332 }
  0xd7   :  { %v410_v47 = vsub.f32 %v1437_v5, %v333_v46 }
  0xd9   :  { %v426_v59 = vmul.f32 1.442695, %v410_v47 }
  0xdb   :  { %1250 = vpow2.f32 %v426_v59 }
  0xde   :  { %v348_v2 = vpop.permute.xlu2 %347 }
  0xdf   :  { %v413_v31 = vsub.f32 %v1447_v10, %v348_v2 }
  0xe1   :  { %v1251_v15 = vpop.eup %1250  ;;  %v432_v37 = vmul.f32 1.442695, %v413_v31 }
  0xe2   :  { %v458_v12 = vsel %vm137_vm0, %v1251_v15, 0.0 }
  0xe3   :  { %1252 = vpow2.f32 %v432_v37  ;;  %459 = vadd.xlane.f32.xlu1 %v458_v12 }
  0xe6   :  { %v353_v22 = vpop.permute.xlu2 %352 }
  0xe7   :  { %v414_v58 = vsub.f32 %v1433_v3, %v353_v22 }
  0xe9   :  { %v1253_v14 = vpop.eup %1252  ;;  %v434_v30 = vmul.f32 1.442695, %v414_v58 }
  0xea   :  { %v467_v53 = vsel %vm137_vm0, %v1253_v14, 0.0 }
  0xeb   :  { %468 = vadd.xlane.f32.xlu1 %v467_v53 }
  0xed   :  { %v343_v1 = vpop.permute.xlu1 %342 }
  0xee   :  { %v412_v52 = vsub.f32 %v1435_v4, %v343_v1  ;;  %v363_v13 = vpop.permute.xlu2 %362 }
  0xef   :  { %v416_v16 = vsub.f32 %v1467_v19, %v363_v13 }
  0xf0   :  { %v430_v21 = vmul.f32 1.442695, %v412_v52 }
  0xf1   :  { %v438_v23 = vmul.f32 1.442695, %v416_v16 }
  0xf2   :  { %1254 = vpow2.f32 %v430_v21 }
  0xf3   :  { %1256 = vpow2.f32 %v438_v23 }
  0xf4   :  { %1258 = vpow2.f32 %v434_v30 }
  0xf5   :  { %v358_v60 = vpop.permute.xlu1 %357 }
  0xf6   :  { %v338_v36 = vpop.permute.xlu0 %337  ;;  %v378_v46 = vpop.permute.xlu2 %377  ;;  %v415_v47 = vsub.f32 %v1445_v9, %v358_v60 }
  0xf7   :  { %v411_v59 = vsub.f32 %v1449_v11, %v338_v36  ;;  %v419_v2 = vsub.f32 %v1482_v26, %v378_v46 }
  0xf8   :  { %v1255_v31 = vpop.eup %1254  ;;  %v436_v53 = vmul.f32 1.442695, %v415_v47 }
  0xf9   :  { %v1257_v15 = vpop.eup %1256  ;;  %v428_v37 = vmul.f32 1.442695, %v411_v59  ;;  %v444_v12 = vmul.f32 1.442695, %v419_v2  ;;  %v464_v22 = vsel %vm137_vm0, %v1255_v31, 0.0 }
  0xfa   :  { %465 = vadd.xlane.f32.xlu2 %v464_v22  ;;  %v476_v14 = vsel %vm137_vm0, %v1257_v15, 0.0  ;;  %v1259_v52 = vpop.eup %1258 }
  0xfb   :  { %1260 = vpow2.f32 %v428_v37  ;;  %477 = vadd.xlane.f32.xlu1 %v476_v14  ;;  %v470_v46 = vsel %vm137_vm0, %v1259_v52, 0.0 }
  0xfc   :  { %1262 = vpow2.f32 %v444_v12 }
  0xfd   :  { %v368_v1 = vpop.permute.xlu1 %367  ;;  %1264 = vpow2.f32 %v436_v53 }
  0xfe   :  { %v417_v13 = vsub.f32 %v1465_v18, %v368_v1  ;;  %v373_v16 = vpop.permute.xlu0 %372  ;;  %v393_v58 = vpop.permute.xlu2 %392 }
  0xff   :  { %v422_v21 = vsub.f32 %v1500_v34, %v393_v58  ;;  %v418_v60 = vsub.f32 %v1463_v17, %v373_v16 }
 0x100   :  { %v440_v23 = vmul.f32 1.442695, %v417_v13 }
 0x101   :  { %v1261_v30 = vpop.eup %1260  ;;  %v450_v36 = vmul.f32 1.442695, %v422_v21  ;;  %v442_v15 = vmul.f32 1.442695, %v418_v60 }
 0x102   :  { %v1263_v47 = vpop.eup %1262  ;;  %1266 = vpow2.f32 %v440_v23  ;;  %v461_v59 = vsel %vm137_vm0, %v1261_v30, 0.0  ;;  %471 = vadd.xlane.f32.xlu2 %v470_v46 }
 0x103   :  { %462 = vadd.xlane.f32.xlu0 %v461_v59  ;;  %v485_v2 = vsel %vm137_vm0, %v1263_v47, 0.0  ;;  %1268 = vpow2.f32 %v450_v36  ;;  %v1265_v31 = vpop.eup %1264 }
 0x104   :  { %486 = vadd.xlane.f32.xlu1 %v485_v2  ;;  %v473_v13 = vsel %vm137_vm0, %v1265_v31, 0.0  ;;  %1270 = vpow2.f32 %v442_v15 }
 0x105   :  { %v383_v37 = vpop.permute.xlu1 %382 }
 0x106   :  { %v420_v12 = vsub.f32 %v1480_v25, %v383_v37  ;;  %v388_v22 = vpop.permute.xlu0 %387  ;;  %v408_v14 = vpop.permute.xlu2 %407 }
 0x107   :  { %v425_v53 = vsub.f32 %v1508_v38, %v408_v14  ;;  %v421_v16 = vsub.f32 %v1478_v24, %v388_v22 }
 0x108   :  { %v1267_v1 = vpop.eup %1266  ;;  %v446_v52 = vmul.f32 1.442695, %v420_v12 }
 0x109   :  { %v456_v58 = vmul.f32 1.442695, %v425_v53  ;;  %v479_v21 = vsel %vm137_vm0, %v1267_v1, 0.0  ;;  %v1269_v23 = vpop.eup %1268  ;;  %v448_v60 = vmul.f32 1.442695, %v421_v16 }
 0x10a   :  { %1272 = vpow2.f32 %v446_v52  ;;  %480 = vadd.xlane.f32.xlu2 %v479_v21  ;;  %v494_v30 = vsel %vm137_vm0, %v1269_v23, 0.0  ;;  %v1271_v59 = vpop.eup %1270  ;;  %v1926_v23 = vld [vmem:[%s2215_s1 + $0x28] sm:$0xff] }
 0x10b   :  { %474 = vadd.xlane.f32.xlu0 %v473_v13  ;;  %1274 = vpow2.f32 %v456_v58  ;;  %v482_v22 = vsel %vm137_vm0, %v1271_v59, 0.0  ;;  %v1961_v59 = vld [vmem:[%s2215_s1 + $0x48] sm:$0xff] }
 0x10c   :  { %495 = vadd.xlane.f32.xlu1 %v494_v30  ;;  %1276 = vpow2.f32 %v448_v60  ;;  %v1932_v30 = vld [vmem:[%s2215_s1 + $0x38] sm:$0xff]  ;;  %v1938_v60 = vld [vmem:[%s2215_s1 + $0x40] sm:$0xff] }
 0x10d   :  { %v398_v36 = vpop.permute.xlu1 %397 }
 0x10e   :  { %v423_v46 = vsub.f32 %v1498_v33, %v398_v36  ;;  %v403_v47 = vpop.permute.xlu0 %402  ;;  %v1943_v36 = vld [vmem:[%s2215_s1 + $0x30] sm:$0xff] }
 0x10f   :  { %v424_v15 = vsub.f32 %v1496_v32, %v403_v47  ;;  %v1956_v47 = vld [vmem:[%s2215_s1 + $0x58] sm:$0xff] }
 0x110   :  { %v1273_v2 = vpop.eup %1272  ;;  %v452_v31 = vmul.f32 1.442695, %v423_v46  ;;  %v1950_v46 = vld [vmem:[%s2215_s1 + $0x50] sm:$0xff] }
 0x111   :  { %v488_v37 = vsel %vm137_vm0, %v1273_v2, 0.0  ;;  %v1275_v12 = vpop.eup %1274  ;;  %v454_v53 = vmul.f32 1.442695, %v424_v15  ;;  %v1968_v2 = vld [vmem:[%s2215_s1 + $0x68] sm:$0xff]  ;;  %v1979_v15 = vld [vmem:[%s2215_s1 + $0x60] sm:$0xff] }
 0x112   :  { %1278 = vpow2.f32 %v452_v31  ;;  %489 = vadd.xlane.f32.xlu2 %v488_v37  ;;  %v503_v14 = vsel %vm137_vm0, %v1275_v12, 0.0  ;;  %v1277_v1 = vpop.eup %1276  ;;  %2247 = vst [vmem:[#allocation21_spill] sm:$0xff] %v1968_v2  ;;  %v1974_v31 = vld [vmem:[%s2215_s1 + $0x70] sm:$0xff]  ;;  %v2250_v37 = vsub.f32 %v1558_v45, %v1582_v51 }
 0x113   :  { %483 = vadd.xlane.f32.xlu0 %v482_v22  ;;  %1280 = vpow2.f32 %v454_v53  ;;  %v491_v16 = vsel %vm137_vm0, %v1277_v1, 0.0  ;;  %2248 = vst [vmem:[#allocation22_spill] sm:$0xff] %v1974_v31  ;;  %v1989_v22 = vld [vmem:[%s2215_s1 + $0x78] sm:$0xff]  ;;  %v2252_v53 = vsub.f32 %v1602_v56, %v1622_v61 }
 0x114   :  { %504 = vadd.xlane.f32.xlu1 %v503_v14  ;;  %2249 = vst [vmem:[#allocation23_spill] sm:$0xff] %v1979_v15  ;;  %v282_v12 = vmul.f32 1.442695, %v2250_v37  ;;  %v557_v37 = vpop.permute.xlu2 %556 }
 0x115   :  { %2251 = vst [vmem:[#allocation24_spill] sm:$0xff] %v1989_v22  ;;  %v1991_v14 = vpop.permute.xlu1 %562  ;;  %v288_v1 = vmul.f32 1.442695, %v2252_v53  ;;  %v2254_v53 = vsub.f32 %v1655_v8, %v1679_v20 }
 0x116   :  { %1282 = vpow2.f32 %v282_v12  ;;  %v132_v12 = vlaneseq  ;;  %v560_v56 = vpop.permute.xlu0 %559 }
 0x117   :  { %1284 = vpow2.f32 %v288_v1  ;;  %v294_v1 = vmul.f32 1.442695, %v2254_v53 }
 0x118   :  { %v1279_v52 = vpop.eup %1278 }
 0x119   :  { %v497_v13 = vsel %vm137_vm0, %v1279_v52, 0.0  ;;  %v1281_v58 = vpop.eup %1280 }
 0x11a   :  { %498 = vadd.xlane.f32.xlu2 %v497_v13  ;;  %v500_v21 = vsel %vm137_vm0, %v1281_v58, 0.0  ;;  %v250_v13 = vld [vmem:[#allocation3] sm:$0xff] }
 0x11b   :  { %492 = vadd.xlane.f32.xlu0 %v491_v16 }
 0x11c   :  { %v1283_v52 = vpop.eup %1282 }
 0x11d   :  { %v314_v16 = vmul.f32 %v1283_v52, %v250_v13  ;;  %v1285_v58 = vpop.eup %1284  ;;  %v2004_v52 = vand.u32 127, %v132_v12  ;;  %v569_v13 = vpop.permute.xlu2 %568 }
 0x11f   :  { %vm603_vm4 = vcmp.eq.s32.totalorder %v2004_v52, %v557_v37  ;;  %vm604_vm5 = vcmp.eq.s32.totalorder %v2004_v52, %v560_v56  ;;  %v2258_v37 = vld [vmem:[#allocation14_spill] sm:$0xff]  ;;  %vm607_vm7 = vcmp.eq.s32.totalorder %v2004_v52, %v569_v13  ;;  %vm605_vm8 = vcmp.eq.s32.totalorder %v2004_v52, %v1991_v14  ;;  %v259_v13 = vld [vmem:[#allocation3 + $0x48] sm:$0xff] }
 0x120   :  { %v2259_v12 = vsub.f32 %v1651_v7, %v2258_v37  ;;  %v254_v7 = vld [vmem:[#allocation3 + $0x20] sm:$0xff] }
 0x122   :  { %v296_v56 = vmul.f32 1.442695, %v2259_v12 }
 0x123   :  { %501 = vadd.xlane.f32.xlu0 %v500_v21  ;;  %v253_v21 = vld [vmem:[#allocation3 + $0x18] sm:$0xff] }
 0x12d   :  { %571 = vperm.xlu1 %1249, %v1926_v23  }
 0x132   :  { %577 = vperm.xlu2 %1247, %v1932_v30  }
 0x135   :  { %580 = vperm.xlu1 %1249, %v1938_v60  }
 0x137   :  { %574 = vperm.xlu0 %1248, %v1943_v36  }
 0x13a   :  { %586 = vperm.xlu2 %1247, %v1950_v46  }
 0x13d   :  { %589 = vperm.xlu1 %1249, %v1956_v47  }
 0x13f   :  { %583 = vperm.xlu0 %1248, %v1961_v59  }
 0x142   :  { %595 = vperm.xlu2 %1247, %v1968_v2  }
 0x145   :  { %598 = vperm.xlu1 %1249, %v1974_v31   ;;  %v317_v31 = vmul.f32 %v1285_v58, %v253_v21 }
 0x147   :  { %592 = vperm.xlu0 %1248, %v1979_v15  }
 0x14f   :  { %601 = vperm.xlu0 %1248, %v1989_v22   ;;  %v2253_v22 = vsub.f32 %v1554_v44, %v1574_v49  ;;  %v619_v49 = vsel %vm603_vm4, %v1437_v5, 0.0  ;;  %v620_v5 = vsel %vm604_vm5, %v1449_v11, 0.0  ;;  %v2260_v11 = vld [vmem:[#allocation12_spill] sm:$0xff] }
 0x150   :  { %v635_v58 = vsel %vm137_vm0, %v619_v49, 0.0  ;;  %v2262_v49 = vld [vmem:[#allocation19_spill] sm:$0xff] }
 0x151   :  { %v286_v2 = vmul.f32 1.442695, %v2253_v22  ;;  %v566_v22 = vpop.permute.xlu0 %565 }
 0x152   :  { %vm606_vm6 = vcmp.eq.s32.totalorder %v2004_v52, %v566_v22 }
 0x153   :  { %1286 = vpow2.f32 %v286_v2  ;;  %v2257_v2 = vsub.f32 %v1704_v29, %v1728_v39  ;;  %v638_v29 = vsel %vm137_vm0, %v620_v5, 0.0  ;;  %v622_v53 = vsel %vm606_vm6, %v1447_v10, 0.0 }
 0x154   :  { %1288 = vpow2.f32 %v294_v1  ;;  %v2261_v1 = vsub.f32 %v1600_v55, %v2260_v11  ;;  %v644_v10 = vsel %vm137_vm0, %v622_v53, 0.0  ;;  %v251_v55 = vld [vmem:[#allocation3 + $0x8] sm:$0xff] }
 0x156   :  { %v460_v45 = vpop.xlane.xlu1 %459 }
 0x157   :  { %v506_v51 = vadd.f32 %v460_v45, %v314_v16  ;;  %v2255_v16 = vsub.f32 %v1552_v43, %v1570_v48  ;;  %v252_v45 = vld [vmem:[#allocation3 + $0x10] sm:$0xff] }
 0x158   :  { %v256_v43 = vld [vmem:[#allocation3 + $0x30] sm:$0xff] }
 0x159   :  { %523 = vst.msk [vmem:[#allocation3] sm:$0xff] %vm19_vm1, %v506_v51  ;;  %v290_v44 = vmul.f32 1.442695, %v2255_v16  ;;  %v1287_v20 = vpop.eup %1286  ;;  %v292_v16 = vmul.f32 1.442695, %v2261_v1  ;;  %v255_v1 = vld [vmem:[#allocation3 + $0x28] sm:$0xff] }
 0x15a   :  { %v1289_v51 = vpop.eup %1288  ;;  %v316_v48 = vmul.f32 %v1287_v20, %v252_v45 }
 0x15b   :  { %1290 = vpow2.f32 %v290_v44 }
 0x15e   :  { %v469_v15 = vpop.xlane.xlu1 %468 }
 0x15f   :  { %v509_v61 = vadd.f32 %v469_v15, %v317_v31  ;;  %v2256_v31 = vsub.f32 %v1606_v57, %v1630_v63  ;;  %v300_v15 = vmul.f32 1.442695, %v2257_v2  ;;  %v320_v57 = vmul.f32 %v1289_v51, %v256_v43 }
 0x160   :  { %v621_v51 = vsel %vm605_vm8, %v1435_v4, 0.0  ;;  %vm929_vm8 = vcmp.ge.s32.totalorder %v1839_v50, 0 }
 0x161   :  { %526 = vst.msk [vmem:[#allocation3 + $0x18] sm:$0xff] %vm19_vm1, %v509_v61  ;;  %v284_v8 = vmul.f32 1.442695, %v2256_v31  ;;  %v1291_v44 = vpop.eup %1290  ;;  %v2263_v31 = vsub.f32 %v1753_v41, %v2262_v49  ;;  %v641_v4 = vsel %vm137_vm0, %v621_v51, 0.0  ;;  %v260_v51 = vld [vmem:[#allocation3 + $0x50] sm:$0xff] }
 0x162   :  { %v318_v22 = vmul.f32 %v1291_v44, %v254_v7 }
 0x163   :  { %1292 = vpow2.f32 %v284_v8  ;;  %v306_v8 = vmul.f32 1.442695, %v2263_v31 }
 0x164   :  { %1294 = vpow2.f32 %v300_v15  ;;  %v623_v15 = vsel %vm607_vm7, %v1433_v3, 0.0  ;;  %v2266_v3 = vld [vmem:[#allocation13_spill] sm:$0xff] }
 0x165   :  { %1296 = vpow2.f32 %v296_v56  ;;  %v647_v14 = vsel %vm137_vm0, %v623_v15, 0.0 }
 0x166   :  { %1298 = vpow2.f32 %v292_v16  ;;  %v262_v16 = vld [vmem:[#allocation3 + $0x60] sm:$0xff] }
 0x167   :  { %1300 = vpow2.f32 %v306_v8 }
 0x169   :  { %v1293_v20 = vpop.eup %1292 }
 0x16a   :  { %v1295_v2 = vpop.eup %1294  ;;  %v315_v41 = vmul.f32 %v1293_v20, %v251_v55 }
 0x16b   :  { %636 = vadd.xlane.f32.xlu2 %v635_v58  ;;  %v323_v43 = vmul.f32 %v1295_v2, %v259_v13  ;;  %v1297_v56 = vpop.eup %1296  ;;  %v2271_v13 = vld [vmem:[#allocation15_spill] sm:$0xff] }
 0x16c   :  { %v1299_v11 = vpop.eup %1298  ;;  %v2272_v15 = vsub.f32 %v1698_v27, %v2271_v13 }
 0x16d   :  { %v466_v63 = vpop.xlane.xlu2 %465  ;;  %v319_v49 = vmul.f32 %v1299_v11, %v255_v1 }
 0x16e   :  { %v478_v21 = vpop.xlane.xlu1 %477  ;;  %v508_v39 = vadd.f32 %v466_v63, %v316_v48  ;;  %v2264_v48 = vld [vmem:[#allocation16_spill] sm:$0xff] }
 0x16f   :  { %v512_v61 = vadd.f32 %v478_v21, %v320_v57  ;;  %639 = vadd.xlane.f32.xlu1 %v638_v29  ;;  %v2265_v57 = vsub.f32 %v1700_v28, %v2264_v48  ;;  %v257_v28 = vld [vmem:[#allocation3 + $0x38] sm:$0xff] }
 0x170   :  { %525 = vst.msk [vmem:[#allocation3 + $0x10] sm:$0xff] %vm19_vm1, %v508_v39  ;;  %v2267_v39 = vsub.f32 %v1649_v6, %v2266_v3  ;;  %v1301_v6 = vpop.eup %1300  ;;  %v321_v44 = vmul.f32 %v1297_v56, %v257_v28  ;;  %v261_v28 = vld [vmem:[#allocation3 + $0x58] sm:$0xff] }
 0x171   :  { %529 = vst.msk [vmem:[#allocation3 + $0x30] sm:$0xff] %vm19_vm1, %v512_v61  ;;  %v302_v63 = vmul.f32 1.442695, %v2265_v57  ;;  %v2268_v61 = vsub.f32 %v1798_v54, %v1821_v62  ;;  %v326_v7 = vmul.f32 %v1301_v6, %v262_v16  ;;  %v2269_v62 = vld [vmem:[#allocation18_spill] sm:$0xff] }
 0x172   :  { %v298_v37 = vmul.f32 1.442695, %v2267_v39  ;;  %v2270_v20 = vsub.f32 %v1749_v0, %v2269_v62  ;;  %v265_v0 = vld [vmem:[#allocation3 + $0x78] sm:$0xff]  ;;  %v2273_v39 = vld [vmem:[#allocation17_spill] sm:$0xff] }
 0x173   :  { %645 = vadd.xlane.f32.xlu2 %v644_v10  ;;  %v312_v53 = vmul.f32 1.442695, %v2268_v61  ;;  %1302 = vpow2.f32 %v302_v63  ;;  %v263_v61 = vld [vmem:[#allocation3 + $0x68] sm:$0xff] }
 0x174   :  { %1304 = vpow2.f32 %v298_v37  ;;  %v308_v10 = vmul.f32 1.442695, %v2270_v20  ;;  %v2274_v37 = vsub.f32 %v1747_v40, %v2273_v39  ;;  %v1029_v39 = vld [vmem:[#allocation5] sm:$0xff] }
 0x175   :  { %v472_v45 = vpop.xlane.xlu2 %471  ;;  %1306 = vpow2.f32 %v312_v53 }
 0x176   :  { %v463_v58 = vpop.xlane.xlu0 %462  ;;  %v510_v5 = vadd.f32 %v472_v45, %v318_v22  ;;  %v304_v22 = vmul.f32 1.442695, %v2272_v15  ;;  %1308 = vpow2.f32 %v308_v10 }
 0x177   :  { %v507_v21 = vadd.f32 %v463_v58, %v315_v41  ;;  %v487_v29 = vpop.xlane.xlu1 %486  ;;  %648 = vadd.xlane.f32.xlu1 %v647_v14 }
 0x178   :  { %v515_v12 = vadd.f32 %v487_v29, %v323_v43  ;;  %527 = vst.msk [vmem:[#allocation3 + $0x20] sm:$0xff] %vm19_vm1, %v510_v5  ;;  %v258_v43 = vld [vmem:[#allocation3 + $0x40] sm:$0xff]  ;;  %1310 = vpow2.f32 %v304_v22 }
 0x179   :  { %524 = vst.msk [vmem:[#allocation3 + $0x8] sm:$0xff] %vm19_vm1, %v507_v21  ;;  %642 = vadd.xlane.f32.xlu0 %v641_v4  ;;  %v1303_v45 = vpop.eup %1302 }
 0x17a   :  { %532 = vst.msk [vmem:[#allocation3 + $0x48] sm:$0xff] %vm19_vm1, %v515_v12  ;;  %v1305_v58 = vpop.eup %1304  ;;  %v324_v5 = vmul.f32 %v1303_v45, %v260_v51  ;;  %v310_v12 = vmul.f32 1.442695, %v2274_v37 }
 0x17b   :  { %v1307_v14 = vpop.eup %1306  ;;  %v322_v48 = vmul.f32 %v1305_v58, %v258_v43 }
 0x17c   :  { %v329_v63 = vmul.f32 %v1307_v14, %v265_v0  ;;  %v1309_v56 = vpop.eup %1308  ;;  %1312 = vpow2.f32 %v310_v12 }
 0x17d   :  { %v481_v31 = vpop.xlane.xlu2 %480  ;;  %v327_v11 = vmul.f32 %v1309_v56, %v263_v61  ;;  %v1036_v56 = vld [vmem:[#allocation5 + $0x38] sm:$0xff]  ;;  %v830_v61 = vld [vmem:[#allocation3] sm:$0xff] }
 0x17e   :  { %v475_v8 = vpop.xlane.xlu0 %474  ;;  %v513_v54 = vadd.f32 %v481_v31, %v321_v44  ;;  %v1311_v53 = vpop.eup %1310  ;;  %v264_v31 = vld [vmem:[#allocation3 + $0x70] sm:$0xff]  ;;  %1314 = vlog2.f32 %v830_v61  ;;  %v817_v61 = vld [vmem:[#allocation2 + $0x18] sm:$0xff] }
 0x17f   :  { %v511_v55 = vadd.f32 %v475_v8, %v319_v49  ;;  %v496_v2 = vpop.xlane.xlu1 %495  ;;  %v325_v1 = vmul.f32 %v1311_v53, %v261_v28  ;;  %v1039_v53 = vld [vmem:[#allocation5 + $0x50] sm:$0xff] }
 0x180   :  { %v518_v41 = vadd.f32 %v496_v2, %v326_v7  ;;  %530 = vst.msk [vmem:[#allocation3 + $0x38] sm:$0xff] %vm19_vm1, %v513_v54  ;;  %v831_v28 = vld [vmem:[#allocation3 + $0x8] sm:$0xff] }
 0x181   :  { %528 = vst.msk [vmem:[#allocation3 + $0x28] sm:$0xff] %vm19_vm1, %v511_v55  ;;  %1316 = vlog2.f32 %v831_v28 }
 0x182   :  { %535 = vst.msk [vmem:[#allocation3 + $0x60] sm:$0xff] %vm19_vm1, %v518_v41  ;;  %v1313_v40 = vpop.eup %1312 }
 0x183   :  { %v328_v8 = vmul.f32 %v1313_v40, %v264_v31  ;;  %v1042_v40 = vld [vmem:[#allocation5 + $0x68] sm:$0xff] }
 0x185   :  { %v490_v57 = vpop.xlane.xlu2 %489 }
 0x186   :  { %v484_v27 = vpop.xlane.xlu0 %483  ;;  %v516_v21 = vadd.f32 %v490_v57, %v324_v5 }
 0x187   :  { %v514_v29 = vadd.f32 %v484_v27, %v322_v48  ;;  %v505_v3 = vpop.xlane.xlu1 %504 }
 0x188   :  { %v521_v4 = vadd.f32 %v505_v3, %v329_v63  ;;  %533 = vst.msk [vmem:[#allocation3 + $0x50] sm:$0xff] %vm19_vm1, %v516_v21 }
 0x189   :  { %531 = vst.msk [vmem:[#allocation3 + $0x40] sm:$0xff] %vm19_vm1, %v514_v29 }
 0x18a   :  { %538 = vst.msk [vmem:[#allocation3 + $0x78] sm:$0xff] %vm19_vm1, %v521_v4  ;;  %v1030_v4 = vld [vmem:[#allocation5 + $0x8] sm:$0xff] }
 0x18d   :  { %v499_v6 = vpop.xlane.xlu2 %498 }
 0x18e   :  { %v493_v16 = vpop.xlane.xlu0 %492  ;;  %v519_v44 = vadd.f32 %v499_v6, %v327_v11  ;;  %v1031_v11 = vld [vmem:[#allocation5 + $0x10] sm:$0xff] }
 0x18f   :  { %v517_v49 = vadd.f32 %v493_v16, %v325_v1  ;;  %v539_v1 = vld [vmem:[#allocation4] sm:$0xff] }
 0x190   :  { %536 = vst.msk [vmem:[#allocation3 + $0x68] sm:$0xff] %vm19_vm1, %v519_v44  ;;  %v1315_v44 = vpop.eup %1314 }
 0x191   :  { %534 = vst.msk [vmem:[#allocation3 + $0x58] sm:$0xff] %vm19_vm1, %v517_v49  ;;  %v540_v49 = vld [vmem:[#allocation4 + $0x8] sm:$0xff] }
 0x195   :  { %v578_v7 = vpop.permute.xlu2 %577 }
 0x196   :  { %v502_v54 = vpop.xlane.xlu0 %501  ;;  %vm610_vm9 = vcmp.eq.s32.totalorder %v2004_v52, %v578_v7  ;;  %v833_v7 = vld [vmem:[#allocation3 + $0x18] sm:$0xff] }
 0x197   :  { %v520_v62 = vadd.f32 %v502_v54, %v328_v8  ;;  %v626_v20 = vsel %vm610_vm9, %v1465_v18, 0.0  ;;  %v847_v8 = vmul.f32 0.6931472, %v1315_v44  ;;  %1318 = vlog2.f32 %v833_v7  ;;  %v1040_v44 = vld [vmem:[#allocation5 + $0x58] sm:$0xff] }
 0x198   :  { %v656_v10 = vsel %vm137_vm0, %v626_v20, 0.0  ;;  %v832_v20 = vld [vmem:[#allocation3 + $0x10] sm:$0xff]  ;;  %vm930_vm9 = vcmp.ge.s32.totalorder %v1870_v42, 0 }
 0x199   :  { %537 = vst.msk [vmem:[#allocation3 + $0x70] sm:$0xff] %vm19_vm1, %v520_v62  ;;  %657 = vadd.xlane.f32.xlu1 %v656_v10  ;;  %v1317_v62 = vpop.eup %1316  ;;  %v1034_v10 = vld [vmem:[#allocation5 + $0x28] sm:$0xff]  ;;  %1320 = vlog2.f32 %v832_v20 }
 0x19d   :  { %v587_v55 = vpop.permute.xlu2 %586 }
 0x19e   :  { %vm613_vm10 = vcmp.eq.s32.totalorder %v2004_v52, %v587_v55  ;;  %v542_v55 = vld [vmem:[#allocation4 + $0x18] sm:$0xff] }
 0x19f   :  { %v572_v2 = vpop.permute.xlu1 %571  ;;  %v629_v13 = vsel %vm613_vm10, %v1480_v25, 0.0  ;;  %vm931_vm10 = vcmp.ge.s32.totalorder %v1926_v23, 0  ;;  %v841_v23 = vld [vmem:[#allocation3 + $0x58] sm:$0xff] }
 0x1a0   :  { %vm608_vm11 = vcmp.eq.s32.totalorder %v2004_v52, %v572_v2  ;;  %v665_v15 = vsel %vm137_vm0, %v629_v13, 0.0  ;;  %v834_v2 = vld [vmem:[#allocation3 + $0x20] sm:$0xff] }
 0x1a1   :  { %v624_v22 = vsel %vm608_vm11, %v1445_v9, 0.0  ;;  %666 = vadd.xlane.f32.xlu1 %v665_v15  ;;  %v814_v13 = vld [vmem:[#allocation2] sm:$0xff]  ;;  %v1038_v15 = vld [vmem:[#allocation5 + $0x48] sm:$0xff]  ;;  %1322 = vlog2.f32 %v834_v2  ;;  %vm933_vm11 = vcmp.ge.s32.totalorder %v1932_v30, 0 }
 0x1a2   :  { %v650_v18 = vsel %vm137_vm0, %v624_v22, 0.0 }
 0x1a3   :  { %651 = vadd.xlane.f32.xlu0 %v650_v18  ;;  %v849_v18 = vmul.f32 0.6931472, %v1317_v62  ;;  %v1044_v62 = vld [vmem:[#allocation5 + $0x78] sm:$0xff] }
 0x1a5   :  { %v596_v41 = vpop.permute.xlu2 %595 }
 0x1a6   :  { %vm616_vm12 = vcmp.eq.s32.totalorder %v2004_v52, %v596_v41  ;;  %v878_v41 = vadd.f32 %v847_v8, %v814_v13 }
 0x1a7   :  { %v581_v45 = vpop.permute.xlu1 %580  ;;  %v632_v51 = vsel %vm616_vm12, %v1498_v33, 0.0  ;;  %vm932_vm12 = vcmp.ge.s32.totalorder %v1943_v36, 0 }
 0x1a8   :  { %vm611_vm13 = vcmp.eq.s32.totalorder %v2004_v52, %v581_v45  ;;  %v674_v25 = vsel %vm137_vm0, %v632_v51, 0.0 }
 0x1a9   :  { %v575_v58 = vpop.permute.xlu0 %574  ;;  %v627_v43 = vsel %vm611_vm13, %v1463_v17, 0.0  ;;  %675 = vadd.xlane.f32.xlu1 %v674_v25  ;;  %v543_v25 = vld [vmem:[#allocation4 + $0x20] sm:$0xff]  ;;  %vm934_vm13 = vcmp.ge.s32.totalorder %v1938_v60, 0 }
 0x1aa   :  { %vm609_vm14 = vcmp.eq.s32.totalorder %v2004_v52, %v575_v58  ;;  %v659_v9 = vsel %vm137_vm0, %v627_v43, 0.0  ;;  %v2275_v58 = vld [vmem:[#allocation20_spill] sm:$0xff] }
 0x1ab   :  { %660 = vadd.xlane.f32.xlu0 %v659_v9  ;;  %v625_v14 = vsel %vm609_vm14, %v1467_v19, 0.0  ;;  %vm927_vm6 = vcmp.ge.s32.totalorder %v2275_v58, 0  ;;  %v2276_v9 = vmov 0.0   ;;  %vm936_vm14 = vcmp.ge.s32.totalorder %v1950_v46, 0 }
 0x1ac   :  { %v653_v0 = vsel %vm137_vm0, %v625_v14, 0.0  ;;  %v1190_v7 = vsel %vm929_vm8, 1.0, %v2276_v9  ;;  %vm1104_vm8 = vcmask 261312  }
 0x1ad   :  { %654 = vadd.xlane.f32.xlu2 %v653_v0  ;;  %v815_v0 = vld [vmem:[#allocation2 + $0x8] sm:$0xff] }
 0x1af   :  { %v590_v5 = vpop.permute.xlu1 %589 }
 0x1b0   :  { %vm614_vm15 = vcmp.eq.s32.totalorder %v2004_v52, %v590_v5 }
 0x1b1   :  { %v584_v33 = vpop.permute.xlu0 %583  ;;  %v630_v48 = vsel %vm614_vm15, %v1478_v24, 0.0  ;;  %vm935_vm15 = vcmp.ge.s32.totalorder %v1961_v59, 0 }
 0x1b2   :  { %vm612_vm2 = vcmp.eq.s32.totalorder %v2004_v52, %v584_v33  ;;  %v668_v17 = vsel %vm137_vm0, %v630_v48, 0.0  ;;  %v541_v33 = vld [vmem:[#allocation4 + $0x10] sm:$0xff]  ;;  %v879_v48 = vadd.f32 %v849_v18, %v815_v0 }
 0x1b3   :  { %669 = vadd.xlane.f32.xlu0 %v668_v17  ;;  %v628_v57 = vsel %vm612_vm2, %v1482_v26, 0.0  ;;  %v549_v0 = vld [vmem:[#allocation4 + $0x50] sm:$0xff]  ;;  %vm937_vm2 = vcmp.ge.s32.totalorder %v1956_v47, 0 }
 0x1b4   :  { %v662_v27 = vsel %vm137_vm0, %v628_v57, 0.0  ;;  %v1319_v57 = vpop.eup %1318  ;;  %v2279_v47 = vld [vmem:[#allocation22_spill] sm:$0xff] }
 0x1b5   :  { %663 = vadd.xlane.f32.xlu2 %v662_v27  ;;  %v1188_v27 = vsel %vm927_vm6, 1.0, %v2276_v9  ;;  %vm1096_vm6 = vcmask 130112  }
 0x1b7   :  { %v599_v19 = vpop.permute.xlu1 %598 }
 0x1b8   :  { %vm617_vm3 = vcmp.eq.s32.totalorder %v2004_v52, %v599_v19 }
 0x1b9   :  { %v593_v63 = vpop.permute.xlu0 %592  ;;  %v633_v21 = vsel %vm617_vm3, %v1496_v32, 0.0  ;;  %v1033_v32 = vld [vmem:[#allocation5 + $0x20] sm:$0xff] }
 0x1ba   :  { %vm615_vm4 = vcmp.eq.s32.totalorder %v2004_v52, %v593_v63  ;;  %v677_v24 = vsel %vm137_vm0, %v633_v21, 0.0  ;;  %v1037_v21 = vld [vmem:[#allocation5 + $0x40] sm:$0xff] }
 0x1bb   :  { %678 = vadd.xlane.f32.xlu0 %v677_v24  ;;  %v631_v29 = vsel %vm615_vm4, %v1500_v34, 0.0  ;;  %v1032_v34 = vld [vmem:[#allocation5 + $0x18] sm:$0xff]  ;;  %v1321_v24 = vpop.eup %1320 }
 0x1bc   :  { %v671_v3 = vsel %vm137_vm0, %v631_v29, 0.0 }
 0x1bd   :  { %672 = vadd.xlane.f32.xlu2 %v671_v3 }
 0x1c1   :  { %v602_v26 = vpop.permute.xlu0 %601 }
 0x1c2   :  { %vm618_vm5 = vcmp.eq.s32.totalorder %v2004_v52, %v602_v26  ;;  %1046 = vperm.xlu1 %1249, %v1029_v39   ;;  %v1041_v39 = vld [vmem:[#allocation5 + $0x60] sm:$0xff] }
 0x1c3   :  { %v634_v37 = vsel %vm618_vm5, %v1508_v38, 0.0  ;;  %v1035_v38 = vld [vmem:[#allocation5 + $0x30] sm:$0xff]  ;;  %vm940_vm5 = vcmp.ge.s32.totalorder %v2279_v47, 0 }
 0x1c4   :  { %v680_v12 = vsel %vm137_vm0, %v634_v37, 0.0  ;;  %vm926_vm0 = vcmp.ge.s32.totalorder %v1855_v35, 0  ;;  %v1323_v35 = vpop.eup %1322  ;;  %v853_v37 = vmul.f32 0.6931472, %v1319_v57 }
 0x1c5   :  { %681 = vadd.xlane.f32.xlu2 %v680_v12  ;;  %v1187_v14 = vsel %vm926_vm0, 1.0, %v2276_v9 }
 0x1ca   :  { %1058 = vperm.xlu1 %1249, %v1033_v32   ;;  %v851_v32 = vmul.f32 0.6931472, %v1321_v24  ;;  %v552_v24 = vld [vmem:[#allocation4 + $0x68] sm:$0xff] }
 0x1cf   :  { %1049 = vperm.xlu0 %1248, %v1030_v4   ;;  %v855_v4 = vmul.f32 0.6931472, %v1323_v35 }
 0x1d2   :  { %1067 = vperm.xlu1 %1249, %v1036_v56  }
 0x1d7   :  { %1055 = vperm.xlu0 %1248, %v1032_v34  }
 0x1da   :  { %1076 = vperm.xlu1 %1249, %v1039_v53  }
 0x1dd   :  { %1052 = vperm.xlu2 %1247, %v1031_v11   ;;  %v1346_v11 = vld [vmem:[%s2215_s1 + $0x10] sm:$0xff]  ;;  %s1402_s1 = smov [#allocation8]  }
 0x1de   :  { %v637_v6 = vpop.xlane.xlu2 %636  ;;  %vm928_vm7 = vcmp.ge.s32.totalorder %v1346_v11, 0  ;;  %s1171_s6 = sshll.u32 %s1402_s1, 4  ;;  %s1172_s6 = int_to_ptr.vmem [resolvable:$true] %s1171_s6 }
 0x1df   :  { %1064 = vperm.xlu0 %1248, %v1035_v38   ;;  %v683_v16 = vadd.f32 %v637_v6, %v539_v1  ;;  %v881_v1 = vadd.f32 %v853_v37, %v817_v61  ;;  %v818_v38 = vld [vmem:[#allocation2 + $0x20] sm:$0xff]  ;;  %v1189_v8 = vsel %vm928_vm7, 1.0, %v2276_v9  ;;  %v545_v37 = vld [vmem:[#allocation4 + $0x30] sm:$0xff]  ;;  %v1192_v61 = vsel %vm931_vm10, 1.0, %v2276_v9 }
 0x1e0   :  { %vm1100_vm7 = vcmask 195712   ;;  %vm1027_vm10 = vcmask 0  }
 0x1e1   :  { %699 = vst.msk [vmem:[#allocation4] sm:$0xff] %vm19_vm1, %v683_v16  ;;  %v816_v16 = vld [vmem:[#allocation2 + $0x10] sm:$0xff] }
 0x1e2   :  { %v640_v31 = vpop.xlane.xlu1 %639  ;;  %1085 = vperm.xlu1 %1249, %v1042_v40   ;;  %v880_v40 = vadd.f32 %v851_v32, %v816_v16 }
 0x1e3   :  { %v684_v54 = vadd.f32 %v640_v31, %v540_v49  ;;  %v882_v31 = vadd.f32 %v855_v4, %v818_v38  ;;  %v840_v4 = vld [vmem:[#allocation3 + $0x50] sm:$0xff] }
 0x1e5   :  { %700 = vst.msk [vmem:[#allocation4 + $0x8] sm:$0xff] %vm19_vm1, %v684_v54  ;;  %1061 = vperm.xlu2 %1247, %v1034_v10   ;;  %v1191_v10 = vsel %vm930_vm9, 1.0, %v2276_v9  ;;  %vm1112_vm9 = vcmask 392512  }
 0x1e6   :  { %v646_v22 = vpop.xlane.xlu2 %645 }
 0x1e7   :  { %1073 = vperm.xlu0 %1248, %v1038_v15   ;;  %v686_v45 = vadd.f32 %v646_v22, %v542_v55  ;;  %v1043_v15 = vld [vmem:[#allocation5 + $0x70] sm:$0xff] }
 0x1e8   :  { %v894_v51 = vld [vmem:[#allocation4] sm:$0xff] }
 0x1e9   :  { %v910_v43 = vsub.f32 %v878_v41, %v894_v51  ;;  %702 = vst.msk [vmem:[#allocation4 + $0x18] sm:$0xff] %vm19_vm1, %v686_v45 }
 0x1ea   :  { %v649_v5 = vpop.xlane.xlu1 %648 }
 0x1eb   :  { %v687_v17 = vadd.f32 %v649_v5, %v543_v25  ;;  %v974_v29 = vmul.f32 %v1187_v14, %v910_v43  ;;  %v546_v25 = vld [vmem:[#allocation4 + $0x38] sm:$0xff]  ;;  %v835_v14 = vld [vmem:[#allocation3 + $0x28] sm:$0xff] }
 0x1ec   :  { %v895_v19 = vld [vmem:[#allocation4 + $0x8] sm:$0xff]  ;;  %v643_v63 = vpop.xlane.xlu0 %642  ;;  %1324 = vlog2.f32 %v835_v14 }
 0x1ed   :  { %v911_v3 = vsub.f32 %v879_v48, %v895_v19  ;;  %703 = vst.msk [vmem:[#allocation4 + $0x20] sm:$0xff] %vm19_vm1, %v687_v17  ;;  %v685_v26 = vadd.f32 %v643_v63, %v541_v33  ;;  %1070 = vperm.xlu2 %1247, %v1037_v21   ;;  %v990_v56 = vsel %vm19_vm1, %v974_v29, 0.0  ;;  %v544_v5 = vld [vmem:[#allocation4 + $0x28] sm:$0xff]  ;;  %v836_v63 = vld [vmem:[#allocation3 + $0x30] sm:$0xff]  ;;  %v838_v21 = vld [vmem:[#allocation3 + $0x40] sm:$0xff] }
 0x1ef   :  { %v975_v12 = vmul.f32 %v1188_v27, %v911_v3  ;;  %701 = vst.msk [vmem:[#allocation4 + $0x10] sm:$0xff] %vm19_vm1, %v685_v26  ;;  %1082 = vperm.xlu0 %1248, %v1041_v39   ;;  %v837_v27 = vld [vmem:[#allocation3 + $0x38] sm:$0xff]  ;;  %v547_v3 = vld [vmem:[#allocation4 + $0x40] sm:$0xff] }
 0x1f0   :  { %v897_v53 = vld [vmem:[#allocation4 + $0x18] sm:$0xff]  ;;  %1326 = vlog2.f32 %v837_v27 }
 0x1f1   :  { %v991_v34 = vsel %vm19_vm1, %v975_v12, 0.0  ;;  %v913_v49 = vsub.f32 %v881_v1, %v897_v53  ;;  %1328 = vlog2.f32 %v836_v63  ;;  %v819_v12 = vld [vmem:[#allocation2 + $0x28] sm:$0xff]  ;;  %v1195_v63 = vsel %vm934_vm13, 1.0, %v2276_v9 }
 0x1f2   :  { %v992_v28 = vadd.f32 %v991_v34, %v990_v56  ;;  %v1325_v19 = vpop.eup %1324  ;;  %1330 = vlog2.f32 %v838_v21  ;;  %v553_v21 = vld [vmem:[#allocation4 + $0x70] sm:$0xff]  ;;  %vm1124_vm13 = vcmask 589312  }
 0x1f3   :  { %v977_v2 = vmul.f32 %v1190_v7, %v913_v49  ;;  %v857_v29 = vmul.f32 0.6931472, %v1325_v19  ;;  %1332 = vlog2.f32 %v840_v4 }
 0x1f4   :  { %v898_v6 = vld [vmem:[#allocation4 + $0x20] sm:$0xff] }
 0x1f5   :  { %1079 = vperm.xlu2 %1247, %v1040_v44   ;;  %v914_v50 = vsub.f32 %v882_v31, %v898_v6  ;;  %v995_v18 = vsel %vm19_vm1, %v977_v2, 0.0  ;;  %v883_v56 = vadd.f32 %v857_v29, %v819_v12  ;;  %v822_v2 = vld [vmem:[#allocation2 + $0x40] sm:$0xff]  ;;  %v823_v12 = vld [vmem:[#allocation2 + $0x48] sm:$0xff] }
 0x1f6   :  { %v896_v54 = vld [vmem:[#allocation4 + $0x10] sm:$0xff]  ;;  %v1327_v34 = vpop.eup %1326 }
 0x1f7   :  { %v912_v20 = vsub.f32 %v880_v40, %v896_v54  ;;  %1091 = vperm.xlu0 %1248, %v1044_v62   ;;  %v978_v13 = vmul.f32 %v1191_v10, %v914_v50  ;;  %v1329_v1 = vpop.eup %1328  ;;  %v861_v44 = vmul.f32 0.6931472, %v1327_v34  ;;  %v550_v40 = vld [vmem:[#allocation4 + $0x58] sm:$0xff]  ;;  %v548_v62 = vld [vmem:[#allocation4 + $0x48] sm:$0xff] }
 0x1f8   :  { %v1331_v16 = vpop.eup %1330  ;;  %v859_v31 = vmul.f32 0.6931472, %v1329_v1 }
 0x1f9   :  { %v976_v55 = vmul.f32 %v1189_v8, %v912_v20  ;;  %v997_v45 = vsel %vm19_vm1, %v978_v13, 0.0  ;;  %v863_v8 = vmul.f32 0.6931472, %v1331_v16  ;;  %v821_v20 = vld [vmem:[#allocation2 + $0x38] sm:$0xff]  ;;  %v843_v13 = vld [vmem:[#allocation3 + $0x68] sm:$0xff] }
 0x1fb   :  { %v993_v42 = vsel %vm19_vm1, %v976_v55, 0.0  ;;  %v886_v14 = vadd.f32 %v863_v8, %v822_v2 }
 0x1fc   :  { %v994_v22 = vadd.f32 %v993_v42, %v992_v28  ;;  %v839_v28 = vld [vmem:[#allocation3 + $0x48] sm:$0xff]  ;;  %v885_v42 = vadd.f32 %v861_v44, %v821_v20 }
 0x1fd   :  { %1088 = vperm.xlu2 %1247, %v1043_v15   ;;  %1334 = vlog2.f32 %v839_v28  ;;  %v1333_v15 = vpop.eup %1332 }
 0x1fe   :  { %v996_v41 = vadd.f32 %v995_v18, %v994_v22  ;;  %1336 = vlog2.f32 %v841_v23  ;;  %v820_v18 = vld [vmem:[#allocation2 + $0x30] sm:$0xff]  ;;  %v845_v23 = vld [vmem:[#allocation3 + $0x78] sm:$0xff] }
 0x1ff   :  { %1338 = vlog2.f32 %v843_v13 }
 0x200   :  { %v998_v51 = vadd.f32 %v997_v45, %v996_v41  ;;  %v842_v41 = vld [vmem:[#allocation3 + $0x60] sm:$0xff] }
 0x201   :  { %1340 = vlog2.f32 %v842_v41  ;;  %v2278_v41 = vld [vmem:[#allocation23_spill] sm:$0xff] }
 0x202   :  { %vm938_vm4 = vcmp.ge.s32.totalorder %v2278_v41, 0 }
 0x20c   :  { %v658_v58 = vpop.xlane.xlu1 %657 }
 0x20d   :  { %v690_v43 = vadd.f32 %v658_v58, %v546_v25  ;;  %v1335_v25 = vpop.eup %1334 }
 0x20f   :  { %706 = vst.msk [vmem:[#allocation4 + $0x38] sm:$0xff] %vm19_vm1, %v690_v43  ;;  %v884_v43 = vadd.f32 %v859_v31, %v820_v18  ;;  %v1196_v31 = vsel %vm935_vm15, 1.0, %v2276_v9  ;;  %vm1132_vm15 = vcmask 720512  }
 0x214   :  { %v667_v33 = vpop.xlane.xlu1 %666 }
 0x215   :  { %v693_v48 = vadd.f32 %v667_v33, %v549_v0  ;;  %v1194_v33 = vsel %vm933_vm11, 1.0, %v2276_v9  ;;  %vm1116_vm11 = vcmask 458112  }
 0x216   :  { %v652_v17 = vpop.xlane.xlu0 %651  ;;  %v901_v50 = vld [vmem:[#allocation4 + $0x38] sm:$0xff] }
 0x217   :  { %v688_v57 = vadd.f32 %v652_v17, %v544_v5  ;;  %709 = vst.msk [vmem:[#allocation4 + $0x50] sm:$0xff] %vm19_vm1, %v693_v48  ;;  %v917_v0 = vsub.f32 %v885_v42, %v901_v50  ;;  %v1337_v5 = vpop.eup %1336  ;;  %v1193_v48 = vsel %vm932_vm12, 1.0, %v2276_v9  ;;  %v2277_v42 = vld [vmem:[#allocation21_spill] sm:$0xff]  ;;  %vm1120_vm12 = vcmask 523712  }
 0x218   :  { %v869_v30 = vmul.f32 0.6931472, %v1337_v5  ;;  %vm939_vm3 = vcmp.ge.s32.totalorder %v2277_v42, 0 }
 0x219   :  { %704 = vst.msk [vmem:[#allocation4 + $0x28] sm:$0xff] %vm19_vm1, %v688_v57  ;;  %v867_v57 = vmul.f32 0.6931472, %v1333_v15  ;;  %v554_v15 = vld [vmem:[#allocation4 + $0x78] sm:$0xff] }
 0x21c   :  { %v676_v26 = vpop.xlane.xlu1 %675 }
 0x21d   :  { %v696_v35 = vadd.f32 %v676_v26, %v552_v24  ;;  %v865_v24 = vmul.f32 0.6931472, %v1335_v25  ;;  %v551_v26 = vld [vmem:[#allocation4 + $0x60] sm:$0xff] }
 0x21e   :  { %v661_v39 = vpop.xlane.xlu0 %660 }
 0x21f   :  { %v691_v32 = vadd.f32 %v661_v39, %v547_v3  ;;  %712 = vst.msk [vmem:[#allocation4 + $0x68] sm:$0xff] %vm19_vm1, %v696_v35  ;;  %v981_v3 = vmul.f32 %v1194_v33, %v917_v0  ;;  %v824_v35 = vld [vmem:[#allocation2 + $0x50] sm:$0xff] }
 0x220   :  { %v655_v53 = vpop.xlane.xlu2 %654  ;;  %v899_v11 = vld [vmem:[#allocation4 + $0x28] sm:$0xff]  ;;  %v904_v39 = vld [vmem:[#allocation4 + $0x50] sm:$0xff] }
 0x221   :  { %707 = vst.msk [vmem:[#allocation4 + $0x40] sm:$0xff] %vm19_vm1, %v691_v32  ;;  %v689_v38 = vadd.f32 %v655_v53, %v545_v37  ;;  %v915_v6 = vsub.f32 %v883_v56, %v899_v11  ;;  %v888_v32 = vadd.f32 %v867_v57, %v824_v35  ;;  %v1339_v56 = vpop.eup %1338  ;;  %v887_v53 = vadd.f32 %v865_v24, %v823_v12 }
 0x222   :  { %v1341_v1 = vpop.eup %1340  ;;  %v1003_v44 = vsel %vm19_vm1, %v981_v3, 0.0  ;;  %v1201_v35 = vsel %vm940_vm5, 1.0, %v2276_v9  ;;  %vm1148_vm5 = vcmask 982912  }
 0x223   :  { %705 = vst.msk [vmem:[#allocation4 + $0x30] sm:$0xff] %vm19_vm1, %v689_v38  ;;  %v979_v49 = vmul.f32 %v1192_v61, %v915_v6  ;;  %v825_v61 = vld [vmem:[#allocation2 + $0x58] sm:$0xff]  ;;  %v920_v16 = vsub.f32 %v888_v32, %v904_v39 }
 0x224   :  { %v889_v6 = vadd.f32 %v869_v30, %v825_v61  ;;  %v829_v61 = vld [vmem:[#allocation2 + $0x78] sm:$0xff] }
 0x225   :  { %v999_v7 = vsel %vm19_vm1, %v979_v49, 0.0 }
 0x226   :  { %v670_v54 = vpop.xlane.xlu0 %669  ;;  %v1000_v10 = vadd.f32 %v999_v7, %v998_v51  ;;  %v844_v51 = vld [vmem:[#allocation3 + $0x70] sm:$0xff]  ;;  %v907_v18 = vld [vmem:[#allocation4 + $0x68] sm:$0xff] }
 0x227   :  { %v694_v55 = vadd.f32 %v670_v54, %v550_v40  ;;  %1342 = vlog2.f32 %v844_v51  ;;  %v1197_v40 = vsel %vm936_vm14, 1.0, %v2276_v9  ;;  %v873_v54 = vmul.f32 0.6931472, %v1339_v56 }
 0x228   :  { %v664_v22 = vpop.xlane.xlu2 %663  ;;  %v902_v45 = vld [vmem:[#allocation4 + $0x40] sm:$0xff]  ;;  %1344 = vlog2.f32 %v845_v23  ;;  %v984_v59 = vmul.f32 %v1197_v40, %v920_v16  ;;  %vm1128_vm14 = vcmask 654912  }
 0x229   :  { %710 = vst.msk [vmem:[#allocation4 + $0x58] sm:$0xff] %vm19_vm1, %v694_v55  ;;  %v692_v58 = vadd.f32 %v664_v22, %v548_v62  ;;  %v918_v19 = vsub.f32 %v886_v14, %v902_v45  ;;  %v871_v55 = vmul.f32 0.6931472, %v1341_v1  ;;  %v827_v22 = vld [vmem:[#allocation2 + $0x68] sm:$0xff]  ;;  %v826_v45 = vld [vmem:[#allocation2 + $0x60] sm:$0xff]  ;;  %v828_v14 = vld [vmem:[#allocation2 + $0x70] sm:$0xff] }
 0x22a   :  { %v900_v17 = vld [vmem:[#allocation4 + $0x30] sm:$0xff]  ;;  %v891_v25 = vadd.f32 %v873_v54, %v827_v22 }
 0x22b   :  { %708 = vst.msk [vmem:[#allocation4 + $0x48] sm:$0xff] %vm19_vm1, %v692_v58  ;;  %v916_v27 = vsub.f32 %v884_v43, %v900_v17  ;;  %v982_v4 = vmul.f32 %v1195_v63, %v918_v19  ;;  %v890_v0 = vadd.f32 %v871_v55, %v826_v45  ;;  %v1200_v63 = vsel %vm939_vm3, 1.0, %v2276_v9 }
 0x22c   :  { %v923_v57 = vsub.f32 %v891_v25, %v907_v18  ;;  %v1114_v45 = vadd.s32 4294967248, %v2004_v52  ;;  %vm1140_vm3 = vcmask 851712  }
 0x22d   :  { %v980_v29 = vmul.f32 %v1193_v48, %v916_v27  ;;  %v1343_v49 = vpop.eup %1342  ;;  %v1005_v50 = vsel %vm19_vm1, %v982_v4, 0.0  ;;  %v1009_v27 = vsel %vm19_vm1, %v984_v59, 0.0  ;;  %v2280_v4 = vld [vmem:[#allocation24_spill] sm:$0xff] }
 0x22e   :  { %v679_v36 = vpop.xlane.xlu0 %678  ;;  %v875_v2 = vmul.f32 0.6931472, %v1343_v49  ;;  %v1345_v19 = vpop.eup %1344  ;;  %v987_v32 = vmul.f32 %v1200_v63, %v923_v57  ;;  %vm941_vm0 = vcmp.ge.s32.totalorder %v2280_v4, 0  ;;  %v1094_v49 = vadd.s32 4294967288, %v2004_v52 }
 0x22f   :  { %v697_v37 = vadd.f32 %v679_v36, %v553_v21  ;;  %v1001_v60 = vsel %vm19_vm1, %v980_v29, 0.0  ;;  %v1199_v21 = vsel %vm938_vm4, 1.0, %v2276_v9  ;;  %v1138_v4 = vadd.s32 4294967200, %v2004_v52 }
 0x230   :  { %v673_v34 = vpop.xlane.xlu2 %672  ;;  %v905_v28 = vld [vmem:[#allocation4 + $0x58] sm:$0xff]  ;;  %v1002_v11 = vadd.f32 %v1001_v60, %v1000_v10  ;;  %v1198_v10 = vsel %vm937_vm2, 1.0, %v2276_v9  ;;  %v892_v17 = vadd.f32 %v875_v2, %v828_v14  ;;  %v1015_v1 = vsel %vm19_vm1, %v987_v32, 0.0 }
 0x231   :  { %713 = vst.msk [vmem:[#allocation4 + $0x70] sm:$0xff] %vm19_vm1, %v697_v37  ;;  %v695_v38 = vadd.f32 %v673_v34, %v551_v26  ;;  %v921_v20 = vsub.f32 %v889_v6, %v905_v28  ;;  %v877_v37 = vmul.f32 0.6931472, %v1345_v19  ;;  %v1126_v19 = vadd.s32 4294967224, %v2004_v52 }
 0x232   :  { %v903_v8 = vld [vmem:[#allocation4 + $0x48] sm:$0xff]  ;;  %v1004_v7 = vadd.f32 %v1003_v44, %v1002_v11  ;;  %v1134_v32 = vadd.s32 4294967208, %v2004_v52  ;;  %vm1136_vm2 = vcmask 786112   ;;  %vm1144_vm4 = vcmask 917312  }
 0x233   :  { %711 = vst.msk [vmem:[#allocation4 + $0x60] sm:$0xff] %vm19_vm1, %v695_v38  ;;  %v919_v62 = vsub.f32 %v887_v53, %v903_v8  ;;  %v985_v58 = vmul.f32 %v1198_v10, %v921_v20  ;;  %v893_v11 = vadd.f32 %v877_v37, %v829_v61  ;;  %v1202_v38 = vsel %vm941_vm0, 1.0, %v2276_v9 }
 0x234   :  { %v1006_v46 = vadd.f32 %v1005_v50, %v1004_v7  ;;  %v1047_v29 = vpop.permute.xlu1 %1046  ;;  %v1098_v7 = vadd.s32 4294967280, %v2004_v52  ;;  %v1102_v20 = vadd.s32 4294967272, %v2004_v52  ;;  %v1142_v61 = vadd.s32 4294967192, %v2004_v52 }
 0x235   :  { %v983_v13 = vmul.f32 %v1196_v31, %v919_v62  ;;  %v1011_v26 = vsel %vm19_vm1, %v985_v58, 0.0  ;;  %v1093_v55 = vperm.slane %v1047_v29, %v2004_v52  ;;  %v1110_v58 = vadd.s32 4294967256, %v2004_v52 }
 0x236   :  { %vm1152_vm0 = vcmask 1048512  }
 0x237   :  { %v1007_v51 = vsel %vm19_vm1, %v983_v13, 0.0 }
 0x238   :  { %v682_v43 = vpop.xlane.xlu2 %681  ;;  %v908_v5 = vld [vmem:[#allocation4 + $0x70] sm:$0xff]  ;;  %v1008_v33 = vadd.f32 %v1007_v51, %v1006_v46 }
 0x239   :  { %v698_v48 = vadd.f32 %v682_v43, %v554_v15  ;;  %v924_v36 = vsub.f32 %v892_v17, %v908_v5  ;;  %v1106_v15 = vadd.s32 4294967264, %v2004_v52 }
 0x23a   :  { %v906_v24 = vld [vmem:[#allocation4 + $0x60] sm:$0xff]  ;;  %v1010_v30 = vadd.f32 %v1009_v27, %v1008_v33 }
 0x23b   :  { %714 = vst.msk [vmem:[#allocation4 + $0x78] sm:$0xff] %vm19_vm1, %v698_v48  ;;  %v922_v3 = vsub.f32 %v890_v0, %v906_v24  ;;  %v988_v60 = vmul.f32 %v1201_v35, %v924_v36  ;;  %v1118_v48 = vadd.s32 4294967240, %v2004_v52 }
 0x23c   :  { %v1012_v39 = vadd.f32 %v1011_v26, %v1010_v30  ;;  %v1059_v31 = vpop.permute.xlu1 %1058  ;;  %v1130_v26 = vadd.s32 4294967216, %v2004_v52 }
 0x23d   :  { %v986_v12 = vmul.f32 %v1199_v21, %v922_v3  ;;  %v1017_v44 = vsel %vm19_vm1, %v988_v60, 0.0  ;;  %v1107_v47 = vperm.slane %v1059_v31, %v1106_v15  ;;  %v1122_v21 = vadd.s32 4294967232, %v2004_v52 }
 0x23f   :  { %v1013_v56 = vsel %vm19_vm1, %v986_v12, 0.0 }
 0x240   :  { %v1053_v34 = vpop.permute.xlu2 %1052  ;;  %v1014_v53 = vadd.f32 %v1013_v56, %v1012_v39 }
 0x241   :  { %v1050_v28 = vpop.permute.xlu0 %1049  ;;  %v1099_v2 = vperm.slane %v1053_v34, %v1098_v7 }
 0x242   :  { %v909_v23 = vld [vmem:[#allocation4 + $0x78] sm:$0xff]  ;;  %v1016_v6 = vadd.f32 %v1015_v1, %v1014_v53  ;;  %v1095_v62 = vperm.slane %v1050_v28, %v1094_v49 }
 0x243   :  { %v925_v16 = vsub.f32 %v893_v11, %v909_v23  ;;  %v1146_v23 = vadd.s32 4294967184, %v2004_v52 }
 0x244   :  { %v1018_v40 = vadd.f32 %v1017_v44, %v1016_v6  ;;  %v1097_v13 = vsel %vm1096_vm6, %v1095_v62, %v1093_v55  ;;  %v1068_v41 = vpop.permute.xlu1 %1067  ;;  %v1150_v44 = vadd.s32 4294967176, %v2004_v52 }
 0x245   :  { %v989_v8 = vmul.f32 %v1202_v38, %v925_v16  ;;  %v1101_v18 = vsel %vm1100_vm7, %v1099_v2, %v1097_v13  ;;  %v1119_v24 = vperm.slane %v1068_v41, %v1118_v48 }
 0x247   :  { %v1019_v54 = vsel %vm19_vm1, %v989_v8, 0.0  ;;  %vm1108_vm1 = vcmask 326912  }
 0x248   :  { %v1062_v50 = vpop.permute.xlu2 %1061  ;;  %v1020_v10 = vadd.f32 %v1019_v54, %v1018_v40 }
 0x249   :  { %v1056_v9 = vpop.permute.xlu0 %1055  ;;  %v1111_v17 = vperm.slane %v1062_v50, %v1110_v58 }
 0x24a   :  { %v1021_v46 = vrot.slane %v1020_v10, 4  ;;  %v1103_v59 = vperm.slane %v1056_v9, %v1102_v20 }
 0x24c   :  { %v1022_v42 = vadd.f32 %v1021_v46, %v1020_v10  ;;  %v1105_v25 = vsel %vm1104_vm8, %v1103_v59, %v1101_v18  ;;  %v1077_v30 = vpop.permute.xlu1 %1076 }
 0x24d   :  { %v1109_v5 = vsel %vm1108_vm1, %v1107_v47, %v1105_v25  ;;  %v1131_v60 = vperm.slane %v1077_v30, %v1130_v26 }
 0x24e   :  { %v1023_v22 = vrot.slane %v1022_v42, 2  ;;  %v1113_v27 = vsel %vm1112_vm9, %v1111_v17, %v1109_v5 }
 0x250   :  { %v1024_v51 = vadd.f32 %v1023_v22, %v1022_v42  ;;  %v1071_v14 = vpop.permute.xlu2 %1070 }
 0x251   :  { %v1065_v43 = vpop.permute.xlu0 %1064  ;;  %v1123_v35 = vperm.slane %v1071_v14, %v1122_v21 }
 0x252   :  { %v1025_v0 = vrot.slane %v1024_v51, 1  ;;  %v1115_v33 = vperm.slane %v1065_v43, %v1114_v45 }
 0x254   :  { %v1026_v57 = vadd.f32 %v1025_v0, %v1024_v51  ;;  %v1117_v63 = vsel %vm1116_vm11, %v1115_v33, %v1113_v27  ;;  %v1086_v11 = vpop.permute.xlu1 %1085 }
 0x255   :  { %v1121_v3 = vsel %vm1120_vm12, %v1119_v24, %v1117_v63  ;;  %v1143_v6 = vperm.slane %v1086_v11, %v1142_v61 }
 0x256   :  { %1028 = vst.msk [vmem:[#allocation8] sm:$0x1] %vm1027_vm10, %v1026_v57  ;;  %v1125_v37 = vsel %vm1124_vm13, %v1123_v35, %v1121_v3 }
 0x257   :  { %1176 = dma.vmem_to_hbm [thread:$0]  %s1172_s6, 16, %s1174_s9, [#allocation9]  }
 0x258   :  { %v1080_v39 = vpop.permute.xlu2 %1079 }
 0x259   :  { %v1074_v29 = vpop.permute.xlu0 %1073  ;;  %v1135_v53 = vperm.slane %v1080_v39, %v1134_v32 }
 0x25a   :  { %v1127_v36 = vperm.slane %v1074_v29, %v1126_v19 }
 0x25c   :  { %v1129_v12 = vsel %vm1128_vm14, %v1127_v36, %v1125_v37 }
 0x25d   :  { %v1133_v56 = vsel %vm1132_vm15, %v1131_v60, %v1129_v12 }
 0x25e   :  { %v1137_v1 = vsel %vm1136_vm2, %v1135_v53, %v1133_v56 }
 0x260   :  { %v1089_v16 = vpop.permute.xlu2 %1088 }
 0x261   :  { %v1083_v34 = vpop.permute.xlu0 %1082  ;;  %v1147_v40 = vperm.slane %v1089_v16, %v1146_v23 }
 0x262   :  { %v1139_v28 = vperm.slane %v1083_v34, %v1138_v4 }
 0x264   :  { %v1141_v38 = vsel %vm1140_vm3, %v1139_v28, %v1137_v1 }
 0x265   :  { %v1145_v49 = vsel %vm1144_vm4, %v1143_v6, %v1141_v38 }
 0x266   :  { %v1149_v7 = vsel %vm1148_vm5, %v1147_v40, %v1145_v49 }
 0x269   :  { %v1092_v31 = vpop.permute.xlu0 %1091 }
 0x26a   :  { %v1151_v8 = vperm.slane %v1092_v31, %v1150_v44 }
 0x26c   :  { %v1153_v54 = vsel %vm1152_vm0, %v1151_v8, %v1149_v7 }
 0x26d   :  { %1154 = vst [vmem:[#allocation6] sm:$0x1] %v1153_v54 }
 0x26e   :  { %1165 = dma.vmem_to_hbm [thread:$0]  %s1161_s10, 16, %s1163_s13, [#allocation7]  }
 0x26f   :  { %1395 = dma.done.wait [#allocation7], 16  }
 0x270   :  { %1396 = vsyncadd [#allocation7], 4294967280 }
 0x271   :  { %1397 = dma.done.wait [#allocation9], 16  }
 0x272   :  { %1398 = vsyncadd [#allocation9], 4294967280 }
 0x273   :  { %1185 = vsyncpa [#allocation7], 1 }
 0x274   :  { %1186 = vsyncpa [#allocation9], 1 }

</bundles_post_ra>
